<compile_context>
chip_gen: v5e
topology: v5e:2x2
jax: 0.10.0
libtpu: 0.0.40
codegen_flags: <defaults>
</compile_context>

<pallas_src>
import jax
import jax.numpy as jnp
from jax.experimental import pallas as pl
from jax.experimental.pallas import tpu as pltpu


# Below this many bytes per operand, pallas_call launch overhead and lost XLA
# fusion outweigh any kernel benefit -> plain jnp add.
_PALLAS_MIN_BYTES = 256 * 1024

# Lane-width candidates (all multiples of 128), largest first.
_LANE_CANDIDATES = (8192, 4096, 2048, 1024, 512, 256, 128)

# Target per-operand tile size (~4 MiB: 3 operands x 2 buffers = 24 MiB fits
# every generation's VMEM with headroom, and amortizes per-step overhead).
_TARGET_TILE_BYTES = 4 * 1024 * 1024


def _add_kernel(a_ref, b_ref, o_ref):
    # Hot path: elementwise add on the current VMEM tile (VPU). Mem-bound.
    o_ref[...] = a_ref[...] + b_ref[...]


def _tpu_cores_and_vmem_cap():
    """Best-effort generation query: (tensorcores per chip, vmem_limit cap)."""
    kind = ""
    try:
        kind = jax.devices()[0].device_kind.lower()
    except Exception:
        pass
    if "v7" in kind:
        # v7x: 2 TCs/chip, only 64 MiB physical VMEM -> leave headroom.
        return 2, 48 * 1024 * 1024
    # v5e / v6e (and unknown): 1 TC, 128 MiB physical VMEM.
    return 1, 64 * 1024 * 1024


def _choose_lane(size, pack, num_tc):
    """Largest lane width that divides `size` and still leaves enough rows."""
    min_rows = max(64, num_tc * 4 * pack)
    dividing = [c for c in _LANE_CANDIDATES if size % c == 0]
    if not dividing:
        return None
    for cand in dividing:          # largest first
        if size // cand >= min_rows:
            return cand
    # No candidate leaves enough rows: maximize rows with the smallest one.
    return dividing[-1]


def _choose_tile_r(rows, lane, dtype_bytes, pack, num_tc):
    """Rows per tile: ~_TARGET_TILE_BYTES, pack-aligned, megacore-balanced."""
    tile_r = (_TARGET_TILE_BYTES // (lane * dtype_bytes)) // pack * pack
    tile_r = max(pack, min(tile_r, rows))

    if num_tc > 1:
        # Force the step count to a positive multiple of num_tc so every
        # TensorCore gets (nearly) equal work.  Only possible if the slab has
        # at least num_tc pack-aligned tiles worth of rows.
        max_steps = rows // pack
        if max_steps >= num_tc:
            steps = -(-rows // tile_r)
            desired = ((steps + num_tc - 1) // num_tc) * num_tc
            desired = max(num_tc, min(desired, (max_steps // num_tc) * num_tc))
            tile_r = -(-rows // desired)
            tile_r = ((tile_r + pack - 1) // pack) * pack
            tile_r = max(pack, min(tile_r, rows))
            # Fix-up: shrink in pack steps until the step count is a clean
            # multiple of num_tc (best effort; stops at one pack per tile).
            while tile_r > pack and (-(-rows // tile_r)) % num_tc != 0:
                tile_r -= pack
    return tile_r


def shortcut(xs, donate_first=False):
    """Pallas equivalent of Shortcut.forward: xs[0] + xs[1].

    xs: sequence of two arrays with identical shape/dtype (NCHW or any shape).
    donate_first: if the caller can donate xs[0], alias it to the output
        (saves a third full-size HBM allocation).
    """
    a, b = xs[0], xs[1]
    assert a.shape == b.shape and a.dtype == b.dtype
    orig_shape = a.shape

    dtype_bytes = jnp.dtype(a.dtype).itemsize
    size = a.size
    total_bytes = size * dtype_bytes

    # --- Tiny-input fallback: let XLA fuse the add into the surrounding graph.
    if total_bytes < _PALLAS_MIN_BYTES:
        return a + b

    # --- Sublane packing: f32 -> 8, bf16/f16 -> 16, int8/fp8 -> 32.
    pack = max(8, 32 // dtype_bytes)

    num_tc, vmem_cap = _tpu_cores_and_vmem_cap()

    # --- Lane-dense width that does not starve the grid of steps.
    lane = _choose_lane(size, pack, num_tc)
    if lane is None:
        # Total size not a multiple of 128: a mem-bound elementwise add gains
        # nothing from a padded Pallas path, so let XLA handle it.
        return a + b

    rows = size // lane

    # Glue: flatten to a lane-dense 2-D slab (rows, lane).
    a2 = a.reshape(rows, lane)
    b2 = b.reshape(rows, lane)

    # --- Tile rows (pack-aligned; even step count across TCs on v7x).
    tile_r = _choose_tile_r(rows, lane, dtype_bytes, pack, num_tc)

    # (8,128) rule: tile dims must be (pack,128)-multiples OR the full extent.
    if tile_r != rows and (tile_r % pack != 0):
        tile_r = rows

    grid = (pl.cdiv(rows, tile_r),)

    # VMEM budget: 3 operands x 2 pipeline buffers x tile, plus slack.
    tile_bytes = tile_r * lane * dtype_bytes
    needed = 3 * 2 * tile_bytes + (4 << 20)
    vmem_limit = min(vmem_cap, max(32 * 1024 * 1024, needed))

    kwargs = {}
    if donate_first:
        kwargs["input_output_aliases"] = {0: 0}

    out2 = pl.pallas_call(
        _add_kernel,
        out_shape=jax.ShapeDtypeStruct((rows, lane), a.dtype),
        grid_spec=pltpu.PrefetchScalarGridSpec(
            num_scalar_prefetch=0,
            grid=grid,
            in_specs=[
                pl.BlockSpec((tile_r, lane), lambda i: (i, 0)),
                pl.BlockSpec((tile_r, lane), lambda i: (i, 0)),
            ],
            out_specs=pl.BlockSpec((tile_r, lane), lambda i: (i, 0)),
        ),
        compiler_params=pltpu.CompilerParams(
            dimension_semantics=("parallel",),
            vmem_limit_bytes=vmem_limit,
        ),
        **kwargs,
    )(a2, b2)

    return out2.reshape(orig_shape)


if __name__ == "__main__":
    key = jax.random.PRNGKey(0)
    k0, k1, k2, k3, k4, k5 = jax.random.split(key, 6)

    # 1) Small NCHW inputs (batch=2, channels=4, spatial=16x16): exercises the
    #    tiny-input fallback path.
    x0 = jax.random.normal(k0, (2, 4, 16, 16), dtype=jnp.float32)
    x1 = jax.random.normal(k1, (2, 4, 16, 16), dtype=jnp.float32)
    out_small = jax.block_until_ready(shortcut([x0, x1]))
    ref_small = x0 + x1
    assert out_small.shape == ref_small.shape and out_small.dtype == ref_small.dtype
    assert jnp.allclose(out_small, ref_small, atol=1e-6, rtol=1e-6)

    # 2) Medium NCHW inputs (batch=2, channels=32, spatial=64x64, ~2 MiB f32):
    #    exercises the lane-dense Pallas path (single or 2-way grid).
    y0 = jax.random.normal(k2, (2, 32, 64, 64), dtype=jnp.float32)
    y1 = jax.random.normal(k3, (2, 32, 64, 64), dtype=jnp.float32)
    out_med = jax.block_until_ready(shortcut([y0, y1]))
    ref_med = y0 + y1
    assert out_med.shape == ref_med.shape and out_med.dtype == ref_med.dtype
    assert jnp.allclose(out_med, ref_med, atol=1e-6, rtol=1e-6)

    # 3) Larger NCHW inputs (batch=2, channels=64, spatial=128x128, 8 MiB f32):
    #    exercises the multi-step pipelined grid with ~4 MiB tiles.
    z0 = jax.random.normal(k4, (2, 64, 128, 128), dtype=jnp.float32)
    z1 = jax.random.normal(k5, (2, 64, 128, 128), dtype=jnp.float32)
    out_big = jax.block_until_ready(shortcut([z0, z1]))
    ref_big = z0 + z1
    assert out_big.shape == ref_big.shape and out_big.dtype == ref_big.dtype
    assert jnp.allclose(out_big, ref_big, atol=1e-6, rtol=1e-6)

    print("KERNEL_OK")
</pallas_src>

<mosaic_0001>
module attributes {stable_mosaic.version = 11 : i64} {
  func.func @_add_kernel(%arg0: i32, %arg1: memref<64x4096xf32, #tpu.memory_space<vmem>>, %arg2: memref<64x4096xf32, #tpu.memory_space<vmem>>, %arg3: memref<64x4096xf32, #tpu.memory_space<vmem>>) attributes {dimension_semantics = [#tpu.dimension_semantics<parallel>], iteration_bounds = array<i64: 1>, scalar_prefetch = 0 : i64, scratch_operands = 0 : i64, tpu.core_type = #tpu.core_type<tc>, window_params = [{transform_indices = @transform_0, window_bounds = array<i64: 64, 4096>}, {transform_indices = @transform_1, window_bounds = array<i64: 64, 4096>}, {transform_indices = @transform_2, window_bounds = array<i64: 64, 4096>}]} {
    %c0 = arith.constant 0 : index
    %c0_0 = arith.constant 0 : index
    %0 = vector.load %arg1[%c0, %c0_0] : memref<64x4096xf32, #tpu.memory_space<vmem>>, vector<64x4096xf32>
    %c0_1 = arith.constant 0 : index
    %c0_2 = arith.constant 0 : index
    %1 = vector.load %arg2[%c0_1, %c0_2] : memref<64x4096xf32, #tpu.memory_space<vmem>>, vector<64x4096xf32>
    %2 = arith.addf %0, %1 : vector<64x4096xf32>
    %c0_3 = arith.constant 0 : index
    %c0_4 = arith.constant 0 : index
    %3 = vector.load %arg3[%c0_3, %c0_4] : memref<64x4096xf32, #tpu.memory_space<vmem>>, vector<64x4096xf32>
    tpu.vector_store %arg3[%c0_3, %c0_4], %2 {strides = array<i32>} : memref<64x4096xf32, #tpu.memory_space<vmem>>, vector<64x4096xf32>,
    return
  }
  func.func @transform_0(%arg0: i32) -> (i32, i32) {
    %c0_i32 = arith.constant 0 : i32
    %c0_i32_0 = arith.constant 0 : i32
    return %arg0, %c0_i32 : i32, i32
  }
  func.func @transform_1(%arg0: i32) -> (i32, i32) {
    %c0_i32 = arith.constant 0 : i32
    %c0_i32_0 = arith.constant 0 : i32
    return %arg0, %c0_i32 : i32, i32
  }
  func.func @transform_2(%arg0: i32) -> (i32, i32) {
    %c0_i32 = arith.constant 0 : i32
    %c0_i32_0 = arith.constant 0 : i32
    return %arg0, %c0_i32 : i32, i32
  }
}

</mosaic_0001>

<bundles_post_ra>
// kernel: tpu_custom_call.1
= control target key start
LH: loop header
LB: loop body
LE: loop exit
PB: predicated region body
PF: predicated region fallthrough
CT: control target
= control target key end

     0   :  { %7 = vsyncpa [#allocation3], 0  ;;  %s1209_s0 = inlined_call_operand.hbm [shape: f32[64,4096], index: 0, kind: input, shape index: {}]   ;;  %s1210_s1 = inlined_call_operand.hbm [shape: f32[64,4096], index: 1, kind: input, shape index: {}]   ;;  %s1211_s2 = inlined_call_operand.hbm [shape: f32[64,4096], index: 2, kind: output, shape index: {}]  }
   0x1   :  { %8 = vsyncpa [#allocation6], 0 }
   0x2   :  { %9 = vsyncpa [#allocation4], 0  ;;  %s14_s11 = sshll.u32 %s1209_s0, 4  ;;  %s1171_s12 = smov [#allocation2]   ;;  %s15_s11 = int_to_ptr.hbm [resolvable:$true] %s14_s11 }
   0x3   :  { %s16_s13 = sshll.u32 %s1171_s12, 4  ;;  %s27_s16 = sshll.u32 %s1210_s1, 4  ;;  %s17_s13 = int_to_ptr.vmem [resolvable:$true] %s16_s13  ;;  %s28_s16 = int_to_ptr.hbm [resolvable:$true] %s27_s16 }
   0x4   :  { %s1172_s17 = smov 4096   ;;  %s1173_s18 = smov 256  }
   0x5   :  { %22 = dma.hbm_to_vmem [thread:$0]  %s15_s11, 32768, %s17_s13, [#allocation3], %s1172_s17, %s1172_s17, %s1173_s18  }
   0x6   :  { %s1174_s19 = smov [#allocation5]  }
   0x7   :  { %s29_s20 = sshll.u32 %s1174_s19, 4  ;;  %s30_s20 = int_to_ptr.vmem [resolvable:$true] %s29_s20 }
   0x8   :  { %35 = dma.hbm_to_vmem [thread:$0]  %s28_s16, 32768, %s30_s20, [#allocation6], %s1172_s17, %s1172_s17, %s1173_s18  }
   0x9   :  { %1165 = dma.done.wait [#allocation3], 32768  }
   0xa   :  { %1166 = vsyncadd [#allocation3], 4294934528 }
   0xb   :  { %1167 = dma.done.wait [#allocation6], 32768  }
   0xc   :  { %1168 = vsyncadd [#allocation6], 4294934528  ;;  %v44_v0 = vld [vmem:[#allocation2] sm:$0xff]  ;;  %v45_v2 = vld [vmem:[#allocation2 + $0x8] sm:$0xff]  ;;  %s1175_s0 = smov [#allocation7]   ;;  %s1074_s23 = sshll.u32 %s1211_s2, 4  ;;  %s1075_s23 = int_to_ptr.hbm [resolvable:$true] %s1074_s23 }
   0xd   :  { %v300_v1 = vld [vmem:[#allocation5] sm:$0xff]  ;;  %v301_v4 = vld [vmem:[#allocation5 + $0x8] sm:$0xff]  ;;  %v46_v5 = vld [vmem:[#allocation2 + $0x10] sm:$0xff]  ;;  %s1072_s1 = sshll.u32 %s1175_s0, 4  ;;  %s1073_s1 = int_to_ptr.vmem [resolvable:$true] %s1072_s1 }
   0xe   :  { %v556_v3 = vadd.f32 %v300_v1, %v44_v0  ;;  %v302_v6 = vld [vmem:[#allocation5 + $0x10] sm:$0xff]  ;;  %v557_v7 = vadd.f32 %v301_v4, %v45_v2  ;;  %v47_v9 = vld [vmem:[#allocation2 + $0x18] sm:$0xff]  ;;  %v48_v11 = vld [vmem:[#allocation2 + $0x20] sm:$0xff] }
   0xf   :  { %v558_v8 = vadd.f32 %v302_v6, %v46_v5  ;;  %v303_v10 = vld [vmem:[#allocation5 + $0x18] sm:$0xff]  ;;  %v304_v13 = vld [vmem:[#allocation5 + $0x20] sm:$0xff]  ;;  %v49_v14 = vld [vmem:[#allocation2 + $0x28] sm:$0xff] }
  0x10   :  { %812 = vst [vmem:[#allocation7] sm:$0xff] %v556_v3  ;;  %v559_v12 = vadd.f32 %v303_v10, %v47_v9  ;;  %v305_v15 = vld [vmem:[#allocation5 + $0x28] sm:$0xff]  ;;  %v560_v16 = vadd.f32 %v304_v13, %v48_v11  ;;  %v50_v18 = vld [vmem:[#allocation2 + $0x30] sm:$0xff]  ;;  %v51_v20 = vld [vmem:[#allocation2 + $0x38] sm:$0xff] }
  0x11   :  { %813 = vst [vmem:[#allocation7 + $0x8] sm:$0xff] %v557_v7  ;;  %v561_v17 = vadd.f32 %v305_v15, %v49_v14  ;;  %v306_v19 = vld [vmem:[#allocation5 + $0x30] sm:$0xff]  ;;  %v307_v22 = vld [vmem:[#allocation5 + $0x38] sm:$0xff]  ;;  %v52_v23 = vld [vmem:[#allocation2 + $0x40] sm:$0xff] }
  0x12   :  { %814 = vst [vmem:[#allocation7 + $0x10] sm:$0xff] %v558_v8  ;;  %v562_v21 = vadd.f32 %v306_v19, %v50_v18  ;;  %v308_v24 = vld [vmem:[#allocation5 + $0x40] sm:$0xff]  ;;  %v563_v25 = vadd.f32 %v307_v22, %v51_v20  ;;  %v53_v26 = vld [vmem:[#allocation2 + $0x48] sm:$0xff]  ;;  %v54_v28 = vld [vmem:[#allocation2 + $0x50] sm:$0xff] }
  0x13   :  { %815 = vst [vmem:[#allocation7 + $0x18] sm:$0xff] %v559_v12  ;;  %v309_v27 = vld [vmem:[#allocation5 + $0x48] sm:$0xff]  ;;  %v564_v29 = vadd.f32 %v308_v24, %v52_v23  ;;  %v310_v30 = vld [vmem:[#allocation5 + $0x50] sm:$0xff]  ;;  %v55_v31 = vld [vmem:[#allocation2 + $0x58] sm:$0xff] }
  0x14   :  { %816 = vst [vmem:[#allocation7 + $0x20] sm:$0xff] %v560_v16  ;;  %v311_v32 = vld [vmem:[#allocation5 + $0x58] sm:$0xff]  ;;  %v565_v33 = vadd.f32 %v309_v27, %v53_v26  ;;  %v56_v34 = vld [vmem:[#allocation2 + $0x60] sm:$0xff]  ;;  %v566_v36 = vadd.f32 %v310_v30, %v54_v28  ;;  %v57_v37 = vld [vmem:[#allocation2 + $0x68] sm:$0xff] }
  0x15   :  { %817 = vst [vmem:[#allocation7 + $0x28] sm:$0xff] %v561_v17  ;;  %v312_v35 = vld [vmem:[#allocation5 + $0x60] sm:$0xff]  ;;  %v313_v38 = vld [vmem:[#allocation5 + $0x68] sm:$0xff]  ;;  %v567_v39 = vadd.f32 %v311_v32, %v55_v31  ;;  %v58_v40 = vld [vmem:[#allocation2 + $0x70] sm:$0xff] }
  0x16   :  { %818 = vst [vmem:[#allocation7 + $0x30] sm:$0xff] %v562_v21  ;;  %v314_v41 = vld [vmem:[#allocation5 + $0x70] sm:$0xff]  ;;  %v568_v42 = vadd.f32 %v312_v35, %v56_v34  ;;  %v59_v43 = vld [vmem:[#allocation2 + $0x78] sm:$0xff]  ;;  %v569_v45 = vadd.f32 %v313_v38, %v57_v37  ;;  %v60_v46 = vld [vmem:[#allocation2 + $0x80] sm:$0xff] }
  0x17   :  { %819 = vst [vmem:[#allocation7 + $0x38] sm:$0xff] %v563_v25  ;;  %v315_v44 = vld [vmem:[#allocation5 + $0x78] sm:$0xff]  ;;  %v316_v47 = vld [vmem:[#allocation5 + $0x80] sm:$0xff]  ;;  %v570_v48 = vadd.f32 %v314_v41, %v58_v40  ;;  %v61_v49 = vld [vmem:[#allocation2 + $0x88] sm:$0xff] }
  0x18   :  { %820 = vst [vmem:[#allocation7 + $0x40] sm:$0xff] %v564_v29  ;;  %v317_v50 = vld [vmem:[#allocation5 + $0x88] sm:$0xff]  ;;  %v571_v51 = vadd.f32 %v315_v44, %v59_v43  ;;  %v62_v52 = vld [vmem:[#allocation2 + $0x90] sm:$0xff]  ;;  %v572_v54 = vadd.f32 %v316_v47, %v60_v46  ;;  %v63_v55 = vld [vmem:[#allocation2 + $0x98] sm:$0xff] }
  0x19   :  { %821 = vst [vmem:[#allocation7 + $0x48] sm:$0xff] %v565_v33  ;;  %v318_v53 = vld [vmem:[#allocation5 + $0x90] sm:$0xff]  ;;  %v319_v56 = vld [vmem:[#allocation5 + $0x98] sm:$0xff]  ;;  %v573_v57 = vadd.f32 %v317_v50, %v61_v49  ;;  %v64_v58 = vld [vmem:[#allocation2 + $0xa0] sm:$0xff] }
  0x1a   :  { %822 = vst [vmem:[#allocation7 + $0x50] sm:$0xff] %v566_v36  ;;  %v320_v59 = vld [vmem:[#allocation5 + $0xa0] sm:$0xff]  ;;  %v574_v60 = vadd.f32 %v318_v53, %v62_v52  ;;  %v65_v61 = vld [vmem:[#allocation2 + $0xa8] sm:$0xff]  ;;  %v575_v63 = vadd.f32 %v319_v56, %v63_v55  ;;  %v66_v0 = vld [vmem:[#allocation2 + $0xb0] sm:$0xff] }
  0x1b   :  { %823 = vst [vmem:[#allocation7 + $0x58] sm:$0xff] %v567_v39  ;;  %v321_v62 = vld [vmem:[#allocation5 + $0xa8] sm:$0xff]  ;;  %v322_v1 = vld [vmem:[#allocation5 + $0xb0] sm:$0xff]  ;;  %v576_v2 = vadd.f32 %v320_v59, %v64_v58  ;;  %v67_v3 = vld [vmem:[#allocation2 + $0xb8] sm:$0xff] }
  0x1c   :  { %824 = vst [vmem:[#allocation7 + $0x60] sm:$0xff] %v568_v42  ;;  %v323_v4 = vld [vmem:[#allocation5 + $0xb8] sm:$0xff]  ;;  %v577_v5 = vadd.f32 %v321_v62, %v65_v61  ;;  %v68_v6 = vld [vmem:[#allocation2 + $0xc0] sm:$0xff]  ;;  %v578_v8 = vadd.f32 %v322_v1, %v66_v0  ;;  %v69_v9 = vld [vmem:[#allocation2 + $0xc8] sm:$0xff] }
  0x1d   :  { %825 = vst [vmem:[#allocation7 + $0x68] sm:$0xff] %v569_v45  ;;  %v324_v7 = vld [vmem:[#allocation5 + $0xc0] sm:$0xff]  ;;  %v325_v10 = vld [vmem:[#allocation5 + $0xc8] sm:$0xff]  ;;  %v579_v11 = vadd.f32 %v323_v4, %v67_v3  ;;  %v70_v12 = vld [vmem:[#allocation2 + $0xd0] sm:$0xff] }
  0x1e   :  { %826 = vst [vmem:[#allocation7 + $0x70] sm:$0xff] %v570_v48  ;;  %v326_v13 = vld [vmem:[#allocation5 + $0xd0] sm:$0xff]  ;;  %v580_v14 = vadd.f32 %v324_v7, %v68_v6  ;;  %v71_v15 = vld [vmem:[#allocation2 + $0xd8] sm:$0xff]  ;;  %v581_v17 = vadd.f32 %v325_v10, %v69_v9  ;;  %v72_v18 = vld [vmem:[#allocation2 + $0xe0] sm:$0xff] }
  0x1f   :  { %827 = vst [vmem:[#allocation7 + $0x78] sm:$0xff] %v571_v51  ;;  %v327_v16 = vld [vmem:[#allocation5 + $0xd8] sm:$0xff]  ;;  %v328_v19 = vld [vmem:[#allocation5 + $0xe0] sm:$0xff]  ;;  %v582_v20 = vadd.f32 %v326_v13, %v70_v12  ;;  %v73_v21 = vld [vmem:[#allocation2 + $0xe8] sm:$0xff] }
  0x20   :  { %828 = vst [vmem:[#allocation7 + $0x80] sm:$0xff] %v572_v54  ;;  %v329_v22 = vld [vmem:[#allocation5 + $0xe8] sm:$0xff]  ;;  %v583_v23 = vadd.f32 %v327_v16, %v71_v15  ;;  %v74_v24 = vld [vmem:[#allocation2 + $0xf0] sm:$0xff]  ;;  %v584_v26 = vadd.f32 %v328_v19, %v72_v18  ;;  %v75_v27 = vld [vmem:[#allocation2 + $0xf8] sm:$0xff] }
  0x21   :  { %829 = vst [vmem:[#allocation7 + $0x88] sm:$0xff] %v573_v57  ;;  %v330_v25 = vld [vmem:[#allocation5 + $0xf0] sm:$0xff]  ;;  %v331_v28 = vld [vmem:[#allocation5 + $0xf8] sm:$0xff]  ;;  %v585_v29 = vadd.f32 %v329_v22, %v73_v21  ;;  %v76_v30 = vld [vmem:[#allocation2 + $0x100] sm:$0xff] }
  0x22   :  { %830 = vst [vmem:[#allocation7 + $0x90] sm:$0xff] %v574_v60  ;;  %v332_v31 = vld [vmem:[#allocation5 + $0x100] sm:$0xff]  ;;  %v586_v32 = vadd.f32 %v330_v25, %v74_v24  ;;  %v77_v33 = vld [vmem:[#allocation2 + $0x108] sm:$0xff]  ;;  %v587_v35 = vadd.f32 %v331_v28, %v75_v27  ;;  %v78_v36 = vld [vmem:[#allocation2 + $0x110] sm:$0xff] }
  0x23   :  { %831 = vst [vmem:[#allocation7 + $0x98] sm:$0xff] %v575_v63  ;;  %v333_v34 = vld [vmem:[#allocation5 + $0x108] sm:$0xff]  ;;  %v334_v37 = vld [vmem:[#allocation5 + $0x110] sm:$0xff]  ;;  %v588_v38 = vadd.f32 %v332_v31, %v76_v30  ;;  %v79_v39 = vld [vmem:[#allocation2 + $0x118] sm:$0xff] }
  0x24   :  { %832 = vst [vmem:[#allocation7 + $0xa0] sm:$0xff] %v576_v2  ;;  %v335_v40 = vld [vmem:[#allocation5 + $0x118] sm:$0xff]  ;;  %v589_v41 = vadd.f32 %v333_v34, %v77_v33  ;;  %v80_v42 = vld [vmem:[#allocation2 + $0x120] sm:$0xff]  ;;  %v590_v44 = vadd.f32 %v334_v37, %v78_v36  ;;  %v81_v45 = vld [vmem:[#allocation2 + $0x128] sm:$0xff] }
  0x25   :  { %833 = vst [vmem:[#allocation7 + $0xa8] sm:$0xff] %v577_v5  ;;  %v336_v43 = vld [vmem:[#allocation5 + $0x120] sm:$0xff]  ;;  %v337_v46 = vld [vmem:[#allocation5 + $0x128] sm:$0xff]  ;;  %v591_v47 = vadd.f32 %v335_v40, %v79_v39  ;;  %v82_v48 = vld [vmem:[#allocation2 + $0x130] sm:$0xff] }
  0x26   :  { %834 = vst [vmem:[#allocation7 + $0xb0] sm:$0xff] %v578_v8  ;;  %v338_v49 = vld [vmem:[#allocation5 + $0x130] sm:$0xff]  ;;  %v592_v50 = vadd.f32 %v336_v43, %v80_v42  ;;  %v83_v51 = vld [vmem:[#allocation2 + $0x138] sm:$0xff]  ;;  %v593_v53 = vadd.f32 %v337_v46, %v81_v45  ;;  %v84_v54 = vld [vmem:[#allocation2 + $0x140] sm:$0xff] }
  0x27   :  { %835 = vst [vmem:[#allocation7 + $0xb8] sm:$0xff] %v579_v11  ;;  %v339_v52 = vld [vmem:[#allocation5 + $0x138] sm:$0xff]  ;;  %v340_v55 = vld [vmem:[#allocation5 + $0x140] sm:$0xff]  ;;  %v594_v56 = vadd.f32 %v338_v49, %v82_v48  ;;  %v85_v57 = vld [vmem:[#allocation2 + $0x148] sm:$0xff] }
  0x28   :  { %836 = vst [vmem:[#allocation7 + $0xc0] sm:$0xff] %v580_v14  ;;  %v341_v58 = vld [vmem:[#allocation5 + $0x148] sm:$0xff]  ;;  %v595_v59 = vadd.f32 %v339_v52, %v83_v51  ;;  %v86_v60 = vld [vmem:[#allocation2 + $0x150] sm:$0xff]  ;;  %v596_v62 = vadd.f32 %v340_v55, %v84_v54  ;;  %v87_v63 = vld [vmem:[#allocation2 + $0x158] sm:$0xff] }
  0x29   :  { %837 = vst [vmem:[#allocation7 + $0xc8] sm:$0xff] %v581_v17  ;;  %v342_v61 = vld [vmem:[#allocation5 + $0x150] sm:$0xff]  ;;  %v343_v0 = vld [vmem:[#allocation5 + $0x158] sm:$0xff]  ;;  %v597_v1 = vadd.f32 %v341_v58, %v85_v57  ;;  %v88_v2 = vld [vmem:[#allocation2 + $0x160] sm:$0xff] }
  0x2a   :  { %838 = vst [vmem:[#allocation7 + $0xd0] sm:$0xff] %v582_v20  ;;  %v344_v3 = vld [vmem:[#allocation5 + $0x160] sm:$0xff]  ;;  %v598_v4 = vadd.f32 %v342_v61, %v86_v60  ;;  %v89_v5 = vld [vmem:[#allocation2 + $0x168] sm:$0xff]  ;;  %v599_v7 = vadd.f32 %v343_v0, %v87_v63  ;;  %v90_v8 = vld [vmem:[#allocation2 + $0x170] sm:$0xff] }
  0x2b   :  { %839 = vst [vmem:[#allocation7 + $0xd8] sm:$0xff] %v583_v23  ;;  %v345_v6 = vld [vmem:[#allocation5 + $0x168] sm:$0xff]  ;;  %v346_v9 = vld [vmem:[#allocation5 + $0x170] sm:$0xff]  ;;  %v600_v10 = vadd.f32 %v344_v3, %v88_v2  ;;  %v91_v11 = vld [vmem:[#allocation2 + $0x178] sm:$0xff] }
  0x2c   :  { %840 = vst [vmem:[#allocation7 + $0xe0] sm:$0xff] %v584_v26  ;;  %v347_v12 = vld [vmem:[#allocation5 + $0x178] sm:$0xff]  ;;  %v601_v13 = vadd.f32 %v345_v6, %v89_v5  ;;  %v92_v14 = vld [vmem:[#allocation2 + $0x180] sm:$0xff]  ;;  %v602_v16 = vadd.f32 %v346_v9, %v90_v8  ;;  %v93_v17 = vld [vmem:[#allocation2 + $0x188] sm:$0xff] }
  0x2d   :  { %841 = vst [vmem:[#allocation7 + $0xe8] sm:$0xff] %v585_v29  ;;  %v348_v15 = vld [vmem:[#allocation5 + $0x180] sm:$0xff]  ;;  %v349_v18 = vld [vmem:[#allocation5 + $0x188] sm:$0xff]  ;;  %v603_v19 = vadd.f32 %v347_v12, %v91_v11  ;;  %v94_v20 = vld [vmem:[#allocation2 + $0x190] sm:$0xff] }
  0x2e   :  { %842 = vst [vmem:[#allocation7 + $0xf0] sm:$0xff] %v586_v32  ;;  %v350_v21 = vld [vmem:[#allocation5 + $0x190] sm:$0xff]  ;;  %v604_v22 = vadd.f32 %v348_v15, %v92_v14  ;;  %v95_v23 = vld [vmem:[#allocation2 + $0x198] sm:$0xff]  ;;  %v605_v25 = vadd.f32 %v349_v18, %v93_v17  ;;  %v96_v26 = vld [vmem:[#allocation2 + $0x1a0] sm:$0xff] }
  0x2f   :  { %843 = vst [vmem:[#allocation7 + $0xf8] sm:$0xff] %v587_v35  ;;  %v351_v24 = vld [vmem:[#allocation5 + $0x198] sm:$0xff]  ;;  %v352_v27 = vld [vmem:[#allocation5 + $0x1a0] sm:$0xff]  ;;  %v606_v28 = vadd.f32 %v350_v21, %v94_v20  ;;  %v97_v29 = vld [vmem:[#allocation2 + $0x1a8] sm:$0xff] }
  0x30   :  { %844 = vst [vmem:[#allocation7 + $0x100] sm:$0xff] %v588_v38  ;;  %v353_v30 = vld [vmem:[#allocation5 + $0x1a8] sm:$0xff]  ;;  %v607_v31 = vadd.f32 %v351_v24, %v95_v23  ;;  %v98_v32 = vld [vmem:[#allocation2 + $0x1b0] sm:$0xff]  ;;  %v608_v34 = vadd.f32 %v352_v27, %v96_v26  ;;  %v99_v35 = vld [vmem:[#allocation2 + $0x1b8] sm:$0xff] }
  0x31   :  { %845 = vst [vmem:[#allocation7 + $0x108] sm:$0xff] %v589_v41  ;;  %v354_v33 = vld [vmem:[#allocation5 + $0x1b0] sm:$0xff]  ;;  %v355_v36 = vld [vmem:[#allocation5 + $0x1b8] sm:$0xff]  ;;  %v609_v37 = vadd.f32 %v353_v30, %v97_v29  ;;  %v100_v38 = vld [vmem:[#allocation2 + $0x1c0] sm:$0xff] }
  0x32   :  { %846 = vst [vmem:[#allocation7 + $0x110] sm:$0xff] %v590_v44  ;;  %v356_v39 = vld [vmem:[#allocation5 + $0x1c0] sm:$0xff]  ;;  %v610_v40 = vadd.f32 %v354_v33, %v98_v32  ;;  %v101_v41 = vld [vmem:[#allocation2 + $0x1c8] sm:$0xff]  ;;  %v611_v43 = vadd.f32 %v355_v36, %v99_v35  ;;  %v102_v44 = vld [vmem:[#allocation2 + $0x1d0] sm:$0xff] }
  0x33   :  { %847 = vst [vmem:[#allocation7 + $0x118] sm:$0xff] %v591_v47  ;;  %v357_v42 = vld [vmem:[#allocation5 + $0x1c8] sm:$0xff]  ;;  %v358_v45 = vld [vmem:[#allocation5 + $0x1d0] sm:$0xff]  ;;  %v612_v46 = vadd.f32 %v356_v39, %v100_v38  ;;  %v103_v47 = vld [vmem:[#allocation2 + $0x1d8] sm:$0xff] }
  0x34   :  { %848 = vst [vmem:[#allocation7 + $0x120] sm:$0xff] %v592_v50  ;;  %v359_v48 = vld [vmem:[#allocation5 + $0x1d8] sm:$0xff]  ;;  %v613_v49 = vadd.f32 %v357_v42, %v101_v41  ;;  %v104_v50 = vld [vmem:[#allocation2 + $0x1e0] sm:$0xff]  ;;  %v614_v52 = vadd.f32 %v358_v45, %v102_v44  ;;  %v361_v54 = vld [vmem:[#allocation5 + $0x1e8] sm:$0xff] }
  0x35   :  { %849 = vst [vmem:[#allocation7 + $0x128] sm:$0xff] %v593_v53  ;;  %v360_v51 = vld [vmem:[#allocation5 + $0x1e0] sm:$0xff]  ;;  %v105_v53 = vld [vmem:[#allocation2 + $0x1e8] sm:$0xff]  ;;  %v615_v55 = vadd.f32 %v359_v48, %v103_v47  ;;  %v362_v57 = vld [vmem:[#allocation5 + $0x1f0] sm:$0xff] }
  0x36   :  { %850 = vst [vmem:[#allocation7 + $0x130] sm:$0xff] %v594_v56  ;;  %v106_v56 = vld [vmem:[#allocation2 + $0x1f0] sm:$0xff]  ;;  %v616_v58 = vadd.f32 %v360_v51, %v104_v50  ;;  %v363_v60 = vld [vmem:[#allocation5 + $0x1f8] sm:$0xff]  ;;  %v617_v61 = vadd.f32 %v361_v54, %v105_v53  ;;  %v364_v63 = vld [vmem:[#allocation5 + $0x200] sm:$0xff] }
  0x37   :  { %851 = vst [vmem:[#allocation7 + $0x138] sm:$0xff] %v595_v59  ;;  %v107_v59 = vld [vmem:[#allocation2 + $0x1f8] sm:$0xff]  ;;  %v618_v0 = vadd.f32 %v362_v57, %v106_v56  ;;  %v365_v2 = vld [vmem:[#allocation5 + $0x208] sm:$0xff]  ;;  %v366_v5 = vld [vmem:[#allocation5 + $0x210] sm:$0xff] }
  0x38   :  { %852 = vst [vmem:[#allocation7 + $0x140] sm:$0xff] %v596_v62  ;;  %v108_v62 = vld [vmem:[#allocation2 + $0x200] sm:$0xff]  ;;  %v619_v3 = vadd.f32 %v363_v60, %v107_v59  ;;  %v367_v8 = vld [vmem:[#allocation5 + $0x218] sm:$0xff]  ;;  %v369_v14 = vld [vmem:[#allocation5 + $0x228] sm:$0xff] }
  0x39   :  { %853 = vst [vmem:[#allocation7 + $0x148] sm:$0xff] %v597_v1  ;;  %v109_v1 = vld [vmem:[#allocation2 + $0x208] sm:$0xff]  ;;  %v620_v6 = vadd.f32 %v364_v63, %v108_v62  ;;  %v368_v11 = vld [vmem:[#allocation5 + $0x220] sm:$0xff]  ;;  %v370_v17 = vld [vmem:[#allocation5 + $0x230] sm:$0xff] }
  0x3a   :  { %854 = vst [vmem:[#allocation7 + $0x150] sm:$0xff] %v598_v4  ;;  %v110_v4 = vld [vmem:[#allocation2 + $0x210] sm:$0xff]  ;;  %v621_v9 = vadd.f32 %v365_v2, %v109_v1  ;;  %v371_v20 = vld [vmem:[#allocation5 + $0x238] sm:$0xff]  ;;  %v372_v23 = vld [vmem:[#allocation5 + $0x240] sm:$0xff] }
  0x3b   :  { %855 = vst [vmem:[#allocation7 + $0x158] sm:$0xff] %v599_v7  ;;  %v111_v7 = vld [vmem:[#allocation2 + $0x218] sm:$0xff]  ;;  %v622_v12 = vadd.f32 %v366_v5, %v110_v4  ;;  %v373_v26 = vld [vmem:[#allocation5 + $0x248] sm:$0xff]  ;;  %v374_v29 = vld [vmem:[#allocation5 + $0x250] sm:$0xff] }
  0x3c   :  { %856 = vst [vmem:[#allocation7 + $0x160] sm:$0xff] %v600_v10  ;;  %v112_v10 = vld [vmem:[#allocation2 + $0x220] sm:$0xff]  ;;  %v623_v15 = vadd.f32 %v367_v8, %v111_v7  ;;  %v375_v32 = vld [vmem:[#allocation5 + $0x258] sm:$0xff]  ;;  %v377_v38 = vld [vmem:[#allocation5 + $0x268] sm:$0xff] }
  0x3d   :  { %857 = vst [vmem:[#allocation7 + $0x168] sm:$0xff] %v601_v13  ;;  %v113_v13 = vld [vmem:[#allocation2 + $0x228] sm:$0xff]  ;;  %v624_v18 = vadd.f32 %v368_v11, %v112_v10  ;;  %v376_v35 = vld [vmem:[#allocation5 + $0x260] sm:$0xff]  ;;  %v378_v41 = vld [vmem:[#allocation5 + $0x270] sm:$0xff] }
  0x3e   :  { %858 = vst [vmem:[#allocation7 + $0x170] sm:$0xff] %v602_v16  ;;  %v114_v16 = vld [vmem:[#allocation2 + $0x230] sm:$0xff]  ;;  %v625_v21 = vadd.f32 %v369_v14, %v113_v13  ;;  %v379_v44 = vld [vmem:[#allocation5 + $0x278] sm:$0xff]  ;;  %v380_v47 = vld [vmem:[#allocation5 + $0x280] sm:$0xff] }
  0x3f   :  { %859 = vst [vmem:[#allocation7 + $0x178] sm:$0xff] %v603_v19  ;;  %v115_v19 = vld [vmem:[#allocation2 + $0x238] sm:$0xff]  ;;  %v626_v24 = vadd.f32 %v370_v17, %v114_v16  ;;  %v381_v50 = vld [vmem:[#allocation5 + $0x288] sm:$0xff]  ;;  %v382_v53 = vld [vmem:[#allocation5 + $0x290] sm:$0xff] }
  0x40   :  { %860 = vst [vmem:[#allocation7 + $0x180] sm:$0xff] %v604_v22  ;;  %v116_v22 = vld [vmem:[#allocation2 + $0x240] sm:$0xff]  ;;  %v627_v27 = vadd.f32 %v371_v20, %v115_v19  ;;  %v383_v56 = vld [vmem:[#allocation5 + $0x298] sm:$0xff]  ;;  %v385_v62 = vld [vmem:[#allocation5 + $0x2a8] sm:$0xff] }
  0x41   :  { %861 = vst [vmem:[#allocation7 + $0x188] sm:$0xff] %v605_v25  ;;  %v117_v25 = vld [vmem:[#allocation2 + $0x248] sm:$0xff]  ;;  %v628_v30 = vadd.f32 %v372_v23, %v116_v22  ;;  %v384_v59 = vld [vmem:[#allocation5 + $0x2a0] sm:$0xff]  ;;  %v386_v1 = vld [vmem:[#allocation5 + $0x2b0] sm:$0xff] }
  0x42   :  { %862 = vst [vmem:[#allocation7 + $0x190] sm:$0xff] %v606_v28  ;;  %v118_v28 = vld [vmem:[#allocation2 + $0x250] sm:$0xff]  ;;  %v629_v33 = vadd.f32 %v373_v26, %v117_v25  ;;  %v387_v4 = vld [vmem:[#allocation5 + $0x2b8] sm:$0xff]  ;;  %v388_v7 = vld [vmem:[#allocation5 + $0x2c0] sm:$0xff] }
  0x43   :  { %863 = vst [vmem:[#allocation7 + $0x198] sm:$0xff] %v607_v31  ;;  %v119_v31 = vld [vmem:[#allocation2 + $0x258] sm:$0xff]  ;;  %v630_v36 = vadd.f32 %v374_v29, %v118_v28  ;;  %v389_v10 = vld [vmem:[#allocation5 + $0x2c8] sm:$0xff]  ;;  %v390_v13 = vld [vmem:[#allocation5 + $0x2d0] sm:$0xff] }
  0x44   :  { %864 = vst [vmem:[#allocation7 + $0x1a0] sm:$0xff] %v608_v34  ;;  %v120_v34 = vld [vmem:[#allocation2 + $0x260] sm:$0xff]  ;;  %v631_v39 = vadd.f32 %v375_v32, %v119_v31  ;;  %v391_v16 = vld [vmem:[#allocation5 + $0x2d8] sm:$0xff]  ;;  %v393_v22 = vld [vmem:[#allocation5 + $0x2e8] sm:$0xff] }
  0x45   :  { %865 = vst [vmem:[#allocation7 + $0x1a8] sm:$0xff] %v609_v37  ;;  %v121_v37 = vld [vmem:[#allocation2 + $0x268] sm:$0xff]  ;;  %v632_v42 = vadd.f32 %v376_v35, %v120_v34  ;;  %v392_v19 = vld [vmem:[#allocation5 + $0x2e0] sm:$0xff]  ;;  %v394_v25 = vld [vmem:[#allocation5 + $0x2f0] sm:$0xff] }
  0x46   :  { %866 = vst [vmem:[#allocation7 + $0x1b0] sm:$0xff] %v610_v40  ;;  %v122_v40 = vld [vmem:[#allocation2 + $0x270] sm:$0xff]  ;;  %v633_v45 = vadd.f32 %v377_v38, %v121_v37  ;;  %v395_v28 = vld [vmem:[#allocation5 + $0x2f8] sm:$0xff]  ;;  %v396_v31 = vld [vmem:[#allocation5 + $0x300] sm:$0xff] }
  0x47   :  { %867 = vst [vmem:[#allocation7 + $0x1b8] sm:$0xff] %v611_v43  ;;  %v123_v43 = vld [vmem:[#allocation2 + $0x278] sm:$0xff]  ;;  %v634_v48 = vadd.f32 %v378_v41, %v122_v40  ;;  %v397_v34 = vld [vmem:[#allocation5 + $0x308] sm:$0xff]  ;;  %v398_v37 = vld [vmem:[#allocation5 + $0x310] sm:$0xff] }
  0x48   :  { %868 = vst [vmem:[#allocation7 + $0x1c0] sm:$0xff] %v612_v46  ;;  %v124_v46 = vld [vmem:[#allocation2 + $0x280] sm:$0xff]  ;;  %v635_v51 = vadd.f32 %v379_v44, %v123_v43  ;;  %v399_v40 = vld [vmem:[#allocation5 + $0x318] sm:$0xff] }
  0x49   :  { %869 = vst [vmem:[#allocation7 + $0x1c8] sm:$0xff] %v613_v49  ;;  %v125_v49 = vld [vmem:[#allocation2 + $0x288] sm:$0xff]  ;;  %v636_v54 = vadd.f32 %v380_v47, %v124_v46  ;;  %v400_v43 = vld [vmem:[#allocation5 + $0x320] sm:$0xff] }
  0x4a   :  { %870 = vst [vmem:[#allocation7 + $0x1d0] sm:$0xff] %v614_v52  ;;  %v126_v52 = vld [vmem:[#allocation2 + $0x290] sm:$0xff]  ;;  %v637_v57 = vadd.f32 %v381_v50, %v125_v49  ;;  %v401_v46 = vld [vmem:[#allocation5 + $0x328] sm:$0xff] }
  0x4b   :  { %871 = vst [vmem:[#allocation7 + $0x1d8] sm:$0xff] %v615_v55  ;;  %v127_v55 = vld [vmem:[#allocation2 + $0x298] sm:$0xff]  ;;  %v638_v60 = vadd.f32 %v382_v53, %v126_v52  ;;  %v402_v49 = vld [vmem:[#allocation5 + $0x330] sm:$0xff] }
  0x4c   :  { %872 = vst [vmem:[#allocation7 + $0x1e0] sm:$0xff] %v616_v58  ;;  %v128_v58 = vld [vmem:[#allocation2 + $0x2a0] sm:$0xff]  ;;  %v639_v63 = vadd.f32 %v383_v56, %v127_v55  ;;  %v403_v52 = vld [vmem:[#allocation5 + $0x338] sm:$0xff] }
  0x4d   :  { %873 = vst [vmem:[#allocation7 + $0x1e8] sm:$0xff] %v617_v61  ;;  %v129_v61 = vld [vmem:[#allocation2 + $0x2a8] sm:$0xff]  ;;  %v640_v2 = vadd.f32 %v384_v59, %v128_v58  ;;  %v404_v55 = vld [vmem:[#allocation5 + $0x340] sm:$0xff] }
  0x4e   :  { %874 = vst [vmem:[#allocation7 + $0x1f0] sm:$0xff] %v618_v0  ;;  %v130_v0 = vld [vmem:[#allocation2 + $0x2b0] sm:$0xff]  ;;  %v641_v5 = vadd.f32 %v385_v62, %v129_v61  ;;  %v405_v58 = vld [vmem:[#allocation5 + $0x348] sm:$0xff] }
  0x4f   :  { %875 = vst [vmem:[#allocation7 + $0x1f8] sm:$0xff] %v619_v3  ;;  %v131_v3 = vld [vmem:[#allocation2 + $0x2b8] sm:$0xff]  ;;  %v642_v8 = vadd.f32 %v386_v1, %v130_v0  ;;  %v406_v61 = vld [vmem:[#allocation5 + $0x350] sm:$0xff] }
  0x50   :  { %876 = vst [vmem:[#allocation7 + $0x200] sm:$0xff] %v620_v6  ;;  %v132_v6 = vld [vmem:[#allocation2 + $0x2c0] sm:$0xff]  ;;  %v643_v11 = vadd.f32 %v387_v4, %v131_v3  ;;  %v407_v0 = vld [vmem:[#allocation5 + $0x358] sm:$0xff] }
  0x51   :  { %877 = vst [vmem:[#allocation7 + $0x208] sm:$0xff] %v621_v9  ;;  %v133_v9 = vld [vmem:[#allocation2 + $0x2c8] sm:$0xff]  ;;  %v644_v14 = vadd.f32 %v388_v7, %v132_v6  ;;  %v408_v3 = vld [vmem:[#allocation5 + $0x360] sm:$0xff] }
  0x52   :  { %878 = vst [vmem:[#allocation7 + $0x210] sm:$0xff] %v622_v12  ;;  %v134_v12 = vld [vmem:[#allocation2 + $0x2d0] sm:$0xff]  ;;  %v645_v17 = vadd.f32 %v389_v10, %v133_v9  ;;  %v409_v6 = vld [vmem:[#allocation5 + $0x368] sm:$0xff] }
  0x53   :  { %879 = vst [vmem:[#allocation7 + $0x218] sm:$0xff] %v623_v15  ;;  %v135_v15 = vld [vmem:[#allocation2 + $0x2d8] sm:$0xff]  ;;  %v646_v20 = vadd.f32 %v390_v13, %v134_v12  ;;  %v410_v9 = vld [vmem:[#allocation5 + $0x370] sm:$0xff] }
  0x54   :  { %880 = vst [vmem:[#allocation7 + $0x220] sm:$0xff] %v624_v18  ;;  %v136_v18 = vld [vmem:[#allocation2 + $0x2e0] sm:$0xff]  ;;  %v647_v23 = vadd.f32 %v391_v16, %v135_v15  ;;  %v411_v12 = vld [vmem:[#allocation5 + $0x378] sm:$0xff] }
  0x55   :  { %881 = vst [vmem:[#allocation7 + $0x228] sm:$0xff] %v625_v21  ;;  %v137_v21 = vld [vmem:[#allocation2 + $0x2e8] sm:$0xff]  ;;  %v648_v26 = vadd.f32 %v392_v19, %v136_v18  ;;  %v412_v15 = vld [vmem:[#allocation5 + $0x380] sm:$0xff] }
  0x56   :  { %882 = vst [vmem:[#allocation7 + $0x230] sm:$0xff] %v626_v24  ;;  %v138_v24 = vld [vmem:[#allocation2 + $0x2f0] sm:$0xff]  ;;  %v649_v29 = vadd.f32 %v393_v22, %v137_v21  ;;  %v413_v18 = vld [vmem:[#allocation5 + $0x388] sm:$0xff] }
  0x57   :  { %883 = vst [vmem:[#allocation7 + $0x238] sm:$0xff] %v627_v27  ;;  %v139_v27 = vld [vmem:[#allocation2 + $0x2f8] sm:$0xff]  ;;  %v650_v32 = vadd.f32 %v394_v25, %v138_v24  ;;  %v414_v21 = vld [vmem:[#allocation5 + $0x390] sm:$0xff] }
  0x58   :  { %884 = vst [vmem:[#allocation7 + $0x240] sm:$0xff] %v628_v30  ;;  %v140_v30 = vld [vmem:[#allocation2 + $0x300] sm:$0xff]  ;;  %v651_v35 = vadd.f32 %v395_v28, %v139_v27  ;;  %v415_v24 = vld [vmem:[#allocation5 + $0x398] sm:$0xff] }
  0x59   :  { %885 = vst [vmem:[#allocation7 + $0x248] sm:$0xff] %v629_v33  ;;  %v141_v33 = vld [vmem:[#allocation2 + $0x308] sm:$0xff]  ;;  %v652_v38 = vadd.f32 %v396_v31, %v140_v30  ;;  %v416_v27 = vld [vmem:[#allocation5 + $0x3a0] sm:$0xff] }
  0x5a   :  { %886 = vst [vmem:[#allocation7 + $0x250] sm:$0xff] %v630_v36  ;;  %v142_v36 = vld [vmem:[#allocation2 + $0x310] sm:$0xff]  ;;  %v653_v41 = vadd.f32 %v397_v34, %v141_v33  ;;  %v417_v30 = vld [vmem:[#allocation5 + $0x3a8] sm:$0xff] }
  0x5b   :  { %887 = vst [vmem:[#allocation7 + $0x258] sm:$0xff] %v631_v39  ;;  %v143_v39 = vld [vmem:[#allocation2 + $0x318] sm:$0xff]  ;;  %v654_v44 = vadd.f32 %v398_v37, %v142_v36  ;;  %v418_v33 = vld [vmem:[#allocation5 + $0x3b0] sm:$0xff] }
  0x5c   :  { %888 = vst [vmem:[#allocation7 + $0x260] sm:$0xff] %v632_v42  ;;  %v144_v42 = vld [vmem:[#allocation2 + $0x320] sm:$0xff]  ;;  %v655_v47 = vadd.f32 %v399_v40, %v143_v39  ;;  %v419_v36 = vld [vmem:[#allocation5 + $0x3b8] sm:$0xff] }
  0x5d   :  { %889 = vst [vmem:[#allocation7 + $0x268] sm:$0xff] %v633_v45  ;;  %v145_v45 = vld [vmem:[#allocation2 + $0x328] sm:$0xff]  ;;  %v656_v50 = vadd.f32 %v400_v43, %v144_v42  ;;  %v420_v39 = vld [vmem:[#allocation5 + $0x3c0] sm:$0xff] }
  0x5e   :  { %890 = vst [vmem:[#allocation7 + $0x270] sm:$0xff] %v634_v48  ;;  %v146_v48 = vld [vmem:[#allocation2 + $0x330] sm:$0xff]  ;;  %v657_v53 = vadd.f32 %v401_v46, %v145_v45  ;;  %v421_v42 = vld [vmem:[#allocation5 + $0x3c8] sm:$0xff] }
  0x5f   :  { %891 = vst [vmem:[#allocation7 + $0x278] sm:$0xff] %v635_v51  ;;  %v147_v51 = vld [vmem:[#allocation2 + $0x338] sm:$0xff]  ;;  %v658_v56 = vadd.f32 %v402_v49, %v146_v48  ;;  %v422_v45 = vld [vmem:[#allocation5 + $0x3d0] sm:$0xff] }
  0x60   :  { %892 = vst [vmem:[#allocation7 + $0x280] sm:$0xff] %v636_v54  ;;  %v148_v54 = vld [vmem:[#allocation2 + $0x340] sm:$0xff]  ;;  %v659_v59 = vadd.f32 %v403_v52, %v147_v51  ;;  %v423_v48 = vld [vmem:[#allocation5 + $0x3d8] sm:$0xff] }
  0x61   :  { %893 = vst [vmem:[#allocation7 + $0x288] sm:$0xff] %v637_v57  ;;  %v149_v57 = vld [vmem:[#allocation2 + $0x348] sm:$0xff]  ;;  %v660_v62 = vadd.f32 %v404_v55, %v148_v54  ;;  %v424_v51 = vld [vmem:[#allocation5 + $0x3e0] sm:$0xff] }
  0x62   :  { %894 = vst [vmem:[#allocation7 + $0x290] sm:$0xff] %v638_v60  ;;  %v150_v60 = vld [vmem:[#allocation2 + $0x350] sm:$0xff]  ;;  %v661_v1 = vadd.f32 %v405_v58, %v149_v57  ;;  %v425_v54 = vld [vmem:[#allocation5 + $0x3e8] sm:$0xff] }
  0x63   :  { %895 = vst [vmem:[#allocation7 + $0x298] sm:$0xff] %v639_v63  ;;  %v151_v63 = vld [vmem:[#allocation2 + $0x358] sm:$0xff]  ;;  %v662_v4 = vadd.f32 %v406_v61, %v150_v60  ;;  %v426_v57 = vld [vmem:[#allocation5 + $0x3f0] sm:$0xff] }
  0x64   :  { %896 = vst [vmem:[#allocation7 + $0x2a0] sm:$0xff] %v640_v2  ;;  %v152_v2 = vld [vmem:[#allocation2 + $0x360] sm:$0xff]  ;;  %v663_v7 = vadd.f32 %v407_v0, %v151_v63  ;;  %v427_v60 = vld [vmem:[#allocation5 + $0x3f8] sm:$0xff] }
  0x65   :  { %897 = vst [vmem:[#allocation7 + $0x2a8] sm:$0xff] %v641_v5  ;;  %v153_v5 = vld [vmem:[#allocation2 + $0x368] sm:$0xff]  ;;  %v664_v10 = vadd.f32 %v408_v3, %v152_v2  ;;  %v428_v63 = vld [vmem:[#allocation5 + $0x400] sm:$0xff] }
  0x66   :  { %898 = vst [vmem:[#allocation7 + $0x2b0] sm:$0xff] %v642_v8  ;;  %v154_v8 = vld [vmem:[#allocation2 + $0x370] sm:$0xff]  ;;  %v665_v13 = vadd.f32 %v409_v6, %v153_v5  ;;  %v429_v2 = vld [vmem:[#allocation5 + $0x408] sm:$0xff] }
  0x67   :  { %899 = vst [vmem:[#allocation7 + $0x2b8] sm:$0xff] %v643_v11  ;;  %v155_v11 = vld [vmem:[#allocation2 + $0x378] sm:$0xff]  ;;  %v666_v16 = vadd.f32 %v410_v9, %v154_v8  ;;  %v430_v5 = vld [vmem:[#allocation5 + $0x410] sm:$0xff] }
  0x68   :  { %900 = vst [vmem:[#allocation7 + $0x2c0] sm:$0xff] %v644_v14  ;;  %v156_v14 = vld [vmem:[#allocation2 + $0x380] sm:$0xff]  ;;  %v667_v19 = vadd.f32 %v411_v12, %v155_v11  ;;  %v431_v8 = vld [vmem:[#allocation5 + $0x418] sm:$0xff] }
  0x69   :  { %901 = vst [vmem:[#allocation7 + $0x2c8] sm:$0xff] %v645_v17  ;;  %v157_v17 = vld [vmem:[#allocation2 + $0x388] sm:$0xff]  ;;  %v668_v22 = vadd.f32 %v412_v15, %v156_v14  ;;  %v432_v11 = vld [vmem:[#allocation5 + $0x420] sm:$0xff] }
  0x6a   :  { %902 = vst [vmem:[#allocation7 + $0x2d0] sm:$0xff] %v646_v20  ;;  %v158_v20 = vld [vmem:[#allocation2 + $0x390] sm:$0xff]  ;;  %v669_v25 = vadd.f32 %v413_v18, %v157_v17  ;;  %v433_v14 = vld [vmem:[#allocation5 + $0x428] sm:$0xff] }
  0x6b   :  { %903 = vst [vmem:[#allocation7 + $0x2d8] sm:$0xff] %v647_v23  ;;  %v159_v23 = vld [vmem:[#allocation2 + $0x398] sm:$0xff]  ;;  %v670_v28 = vadd.f32 %v414_v21, %v158_v20  ;;  %v434_v17 = vld [vmem:[#allocation5 + $0x430] sm:$0xff] }
  0x6c   :  { %904 = vst [vmem:[#allocation7 + $0x2e0] sm:$0xff] %v648_v26  ;;  %v160_v26 = vld [vmem:[#allocation2 + $0x3a0] sm:$0xff]  ;;  %v671_v31 = vadd.f32 %v415_v24, %v159_v23  ;;  %v435_v20 = vld [vmem:[#allocation5 + $0x438] sm:$0xff] }
  0x6d   :  { %905 = vst [vmem:[#allocation7 + $0x2e8] sm:$0xff] %v649_v29  ;;  %v161_v29 = vld [vmem:[#allocation2 + $0x3a8] sm:$0xff]  ;;  %v672_v34 = vadd.f32 %v416_v27, %v160_v26  ;;  %v436_v23 = vld [vmem:[#allocation5 + $0x440] sm:$0xff] }
  0x6e   :  { %906 = vst [vmem:[#allocation7 + $0x2f0] sm:$0xff] %v650_v32  ;;  %v162_v32 = vld [vmem:[#allocation2 + $0x3b0] sm:$0xff]  ;;  %v673_v37 = vadd.f32 %v417_v30, %v161_v29  ;;  %v437_v26 = vld [vmem:[#allocation5 + $0x448] sm:$0xff] }
  0x6f   :  { %907 = vst [vmem:[#allocation7 + $0x2f8] sm:$0xff] %v651_v35  ;;  %v163_v35 = vld [vmem:[#allocation2 + $0x3b8] sm:$0xff]  ;;  %v674_v40 = vadd.f32 %v418_v33, %v162_v32  ;;  %v438_v29 = vld [vmem:[#allocation5 + $0x450] sm:$0xff] }
  0x70   :  { %908 = vst [vmem:[#allocation7 + $0x300] sm:$0xff] %v652_v38  ;;  %v164_v38 = vld [vmem:[#allocation2 + $0x3c0] sm:$0xff]  ;;  %v675_v43 = vadd.f32 %v419_v36, %v163_v35  ;;  %v439_v32 = vld [vmem:[#allocation5 + $0x458] sm:$0xff] }
  0x71   :  { %909 = vst [vmem:[#allocation7 + $0x308] sm:$0xff] %v653_v41  ;;  %v165_v41 = vld [vmem:[#allocation2 + $0x3c8] sm:$0xff]  ;;  %v676_v46 = vadd.f32 %v420_v39, %v164_v38  ;;  %v440_v35 = vld [vmem:[#allocation5 + $0x460] sm:$0xff] }
  0x72   :  { %910 = vst [vmem:[#allocation7 + $0x310] sm:$0xff] %v654_v44  ;;  %v166_v44 = vld [vmem:[#allocation2 + $0x3d0] sm:$0xff]  ;;  %v677_v49 = vadd.f32 %v421_v42, %v165_v41  ;;  %v441_v38 = vld [vmem:[#allocation5 + $0x468] sm:$0xff] }
  0x73   :  { %911 = vst [vmem:[#allocation7 + $0x318] sm:$0xff] %v655_v47  ;;  %v167_v47 = vld [vmem:[#allocation2 + $0x3d8] sm:$0xff]  ;;  %v678_v52 = vadd.f32 %v422_v45, %v166_v44  ;;  %v442_v41 = vld [vmem:[#allocation5 + $0x470] sm:$0xff] }
  0x74   :  { %912 = vst [vmem:[#allocation7 + $0x320] sm:$0xff] %v656_v50  ;;  %v168_v50 = vld [vmem:[#allocation2 + $0x3e0] sm:$0xff]  ;;  %v679_v55 = vadd.f32 %v423_v48, %v167_v47  ;;  %v443_v44 = vld [vmem:[#allocation5 + $0x478] sm:$0xff] }
  0x75   :  { %913 = vst [vmem:[#allocation7 + $0x328] sm:$0xff] %v657_v53  ;;  %v169_v53 = vld [vmem:[#allocation2 + $0x3e8] sm:$0xff]  ;;  %v680_v58 = vadd.f32 %v424_v51, %v168_v50  ;;  %v444_v47 = vld [vmem:[#allocation5 + $0x480] sm:$0xff] }
  0x76   :  { %914 = vst [vmem:[#allocation7 + $0x330] sm:$0xff] %v658_v56  ;;  %v170_v56 = vld [vmem:[#allocation2 + $0x3f0] sm:$0xff]  ;;  %v681_v61 = vadd.f32 %v425_v54, %v169_v53  ;;  %v445_v50 = vld [vmem:[#allocation5 + $0x488] sm:$0xff] }
  0x77   :  { %915 = vst [vmem:[#allocation7 + $0x338] sm:$0xff] %v659_v59  ;;  %v171_v59 = vld [vmem:[#allocation2 + $0x3f8] sm:$0xff]  ;;  %v682_v0 = vadd.f32 %v426_v57, %v170_v56  ;;  %v446_v53 = vld [vmem:[#allocation5 + $0x490] sm:$0xff] }
  0x78   :  { %916 = vst [vmem:[#allocation7 + $0x340] sm:$0xff] %v660_v62  ;;  %v172_v62 = vld [vmem:[#allocation2 + $0x400] sm:$0xff]  ;;  %v683_v3 = vadd.f32 %v427_v60, %v171_v59  ;;  %v447_v56 = vld [vmem:[#allocation5 + $0x498] sm:$0xff] }
  0x79   :  { %917 = vst [vmem:[#allocation7 + $0x348] sm:$0xff] %v661_v1  ;;  %v173_v1 = vld [vmem:[#allocation2 + $0x408] sm:$0xff]  ;;  %v684_v6 = vadd.f32 %v428_v63, %v172_v62  ;;  %v448_v59 = vld [vmem:[#allocation5 + $0x4a0] sm:$0xff] }
  0x7a   :  { %918 = vst [vmem:[#allocation7 + $0x350] sm:$0xff] %v662_v4  ;;  %v174_v4 = vld [vmem:[#allocation2 + $0x410] sm:$0xff]  ;;  %v685_v9 = vadd.f32 %v429_v2, %v173_v1  ;;  %v449_v62 = vld [vmem:[#allocation5 + $0x4a8] sm:$0xff] }
  0x7b   :  { %919 = vst [vmem:[#allocation7 + $0x358] sm:$0xff] %v663_v7  ;;  %v175_v7 = vld [vmem:[#allocation2 + $0x418] sm:$0xff]  ;;  %v686_v12 = vadd.f32 %v430_v5, %v174_v4  ;;  %v450_v1 = vld [vmem:[#allocation5 + $0x4b0] sm:$0xff] }
  0x7c   :  { %920 = vst [vmem:[#allocation7 + $0x360] sm:$0xff] %v664_v10  ;;  %v176_v10 = vld [vmem:[#allocation2 + $0x420] sm:$0xff]  ;;  %v687_v15 = vadd.f32 %v431_v8, %v175_v7  ;;  %v451_v4 = vld [vmem:[#allocation5 + $0x4b8] sm:$0xff] }
  0x7d   :  { %921 = vst [vmem:[#allocation7 + $0x368] sm:$0xff] %v665_v13  ;;  %v177_v13 = vld [vmem:[#allocation2 + $0x428] sm:$0xff]  ;;  %v688_v18 = vadd.f32 %v432_v11, %v176_v10  ;;  %v452_v7 = vld [vmem:[#allocation5 + $0x4c0] sm:$0xff] }
  0x7e   :  { %922 = vst [vmem:[#allocation7 + $0x370] sm:$0xff] %v666_v16  ;;  %v178_v16 = vld [vmem:[#allocation2 + $0x430] sm:$0xff]  ;;  %v689_v21 = vadd.f32 %v433_v14, %v177_v13  ;;  %v453_v10 = vld [vmem:[#allocation5 + $0x4c8] sm:$0xff] }
  0x7f   :  { %923 = vst [vmem:[#allocation7 + $0x378] sm:$0xff] %v667_v19  ;;  %v179_v19 = vld [vmem:[#allocation2 + $0x438] sm:$0xff]  ;;  %v690_v24 = vadd.f32 %v434_v17, %v178_v16  ;;  %v454_v13 = vld [vmem:[#allocation5 + $0x4d0] sm:$0xff] }
  0x80   :  { %924 = vst [vmem:[#allocation7 + $0x380] sm:$0xff] %v668_v22  ;;  %v180_v22 = vld [vmem:[#allocation2 + $0x440] sm:$0xff]  ;;  %v691_v27 = vadd.f32 %v435_v20, %v179_v19  ;;  %v455_v16 = vld [vmem:[#allocation5 + $0x4d8] sm:$0xff] }
  0x81   :  { %925 = vst [vmem:[#allocation7 + $0x388] sm:$0xff] %v669_v25  ;;  %v181_v25 = vld [vmem:[#allocation2 + $0x448] sm:$0xff]  ;;  %v692_v30 = vadd.f32 %v436_v23, %v180_v22  ;;  %v456_v19 = vld [vmem:[#allocation5 + $0x4e0] sm:$0xff] }
  0x82   :  { %926 = vst [vmem:[#allocation7 + $0x390] sm:$0xff] %v670_v28  ;;  %v182_v28 = vld [vmem:[#allocation2 + $0x450] sm:$0xff]  ;;  %v693_v33 = vadd.f32 %v437_v26, %v181_v25  ;;  %v457_v22 = vld [vmem:[#allocation5 + $0x4e8] sm:$0xff] }
  0x83   :  { %927 = vst [vmem:[#allocation7 + $0x398] sm:$0xff] %v671_v31  ;;  %v183_v31 = vld [vmem:[#allocation2 + $0x458] sm:$0xff]  ;;  %v694_v36 = vadd.f32 %v438_v29, %v182_v28  ;;  %v458_v25 = vld [vmem:[#allocation5 + $0x4f0] sm:$0xff] }
  0x84   :  { %928 = vst [vmem:[#allocation7 + $0x3a0] sm:$0xff] %v672_v34  ;;  %v184_v34 = vld [vmem:[#allocation2 + $0x460] sm:$0xff]  ;;  %v695_v39 = vadd.f32 %v439_v32, %v183_v31  ;;  %v459_v28 = vld [vmem:[#allocation5 + $0x4f8] sm:$0xff] }
  0x85   :  { %929 = vst [vmem:[#allocation7 + $0x3a8] sm:$0xff] %v673_v37  ;;  %v185_v37 = vld [vmem:[#allocation2 + $0x468] sm:$0xff]  ;;  %v696_v42 = vadd.f32 %v440_v35, %v184_v34  ;;  %v460_v31 = vld [vmem:[#allocation5 + $0x500] sm:$0xff] }
  0x86   :  { %930 = vst [vmem:[#allocation7 + $0x3b0] sm:$0xff] %v674_v40  ;;  %v186_v40 = vld [vmem:[#allocation2 + $0x470] sm:$0xff]  ;;  %v697_v45 = vadd.f32 %v441_v38, %v185_v37  ;;  %v461_v34 = vld [vmem:[#allocation5 + $0x508] sm:$0xff] }
  0x87   :  { %931 = vst [vmem:[#allocation7 + $0x3b8] sm:$0xff] %v675_v43  ;;  %v187_v43 = vld [vmem:[#allocation2 + $0x478] sm:$0xff]  ;;  %v698_v48 = vadd.f32 %v442_v41, %v186_v40  ;;  %v462_v37 = vld [vmem:[#allocation5 + $0x510] sm:$0xff] }
  0x88   :  { %932 = vst [vmem:[#allocation7 + $0x3c0] sm:$0xff] %v676_v46  ;;  %v188_v46 = vld [vmem:[#allocation2 + $0x480] sm:$0xff]  ;;  %v699_v51 = vadd.f32 %v443_v44, %v187_v43  ;;  %v463_v40 = vld [vmem:[#allocation5 + $0x518] sm:$0xff] }
  0x89   :  { %933 = vst [vmem:[#allocation7 + $0x3c8] sm:$0xff] %v677_v49  ;;  %v189_v49 = vld [vmem:[#allocation2 + $0x488] sm:$0xff]  ;;  %v700_v54 = vadd.f32 %v444_v47, %v188_v46  ;;  %v464_v43 = vld [vmem:[#allocation5 + $0x520] sm:$0xff] }
  0x8a   :  { %934 = vst [vmem:[#allocation7 + $0x3d0] sm:$0xff] %v678_v52  ;;  %v190_v52 = vld [vmem:[#allocation2 + $0x490] sm:$0xff]  ;;  %v701_v57 = vadd.f32 %v445_v50, %v189_v49  ;;  %v465_v46 = vld [vmem:[#allocation5 + $0x528] sm:$0xff] }
  0x8b   :  { %935 = vst [vmem:[#allocation7 + $0x3d8] sm:$0xff] %v679_v55  ;;  %v191_v55 = vld [vmem:[#allocation2 + $0x498] sm:$0xff]  ;;  %v702_v60 = vadd.f32 %v446_v53, %v190_v52  ;;  %v466_v49 = vld [vmem:[#allocation5 + $0x530] sm:$0xff] }
  0x8c   :  { %936 = vst [vmem:[#allocation7 + $0x3e0] sm:$0xff] %v680_v58  ;;  %v192_v58 = vld [vmem:[#allocation2 + $0x4a0] sm:$0xff]  ;;  %v703_v63 = vadd.f32 %v447_v56, %v191_v55  ;;  %v467_v52 = vld [vmem:[#allocation5 + $0x538] sm:$0xff] }
  0x8d   :  { %937 = vst [vmem:[#allocation7 + $0x3e8] sm:$0xff] %v681_v61  ;;  %v193_v61 = vld [vmem:[#allocation2 + $0x4a8] sm:$0xff]  ;;  %v704_v2 = vadd.f32 %v448_v59, %v192_v58  ;;  %v468_v55 = vld [vmem:[#allocation5 + $0x540] sm:$0xff] }
  0x8e   :  { %938 = vst [vmem:[#allocation7 + $0x3f0] sm:$0xff] %v682_v0  ;;  %v194_v0 = vld [vmem:[#allocation2 + $0x4b0] sm:$0xff]  ;;  %v705_v5 = vadd.f32 %v449_v62, %v193_v61  ;;  %v469_v58 = vld [vmem:[#allocation5 + $0x548] sm:$0xff] }
  0x8f   :  { %939 = vst [vmem:[#allocation7 + $0x3f8] sm:$0xff] %v683_v3  ;;  %v195_v3 = vld [vmem:[#allocation2 + $0x4b8] sm:$0xff]  ;;  %v706_v8 = vadd.f32 %v450_v1, %v194_v0  ;;  %v470_v61 = vld [vmem:[#allocation5 + $0x550] sm:$0xff] }
  0x90   :  { %940 = vst [vmem:[#allocation7 + $0x400] sm:$0xff] %v684_v6  ;;  %v196_v6 = vld [vmem:[#allocation2 + $0x4c0] sm:$0xff]  ;;  %v707_v11 = vadd.f32 %v451_v4, %v195_v3  ;;  %v471_v0 = vld [vmem:[#allocation5 + $0x558] sm:$0xff] }
  0x91   :  { %941 = vst [vmem:[#allocation7 + $0x408] sm:$0xff] %v685_v9  ;;  %v197_v9 = vld [vmem:[#allocation2 + $0x4c8] sm:$0xff]  ;;  %v708_v14 = vadd.f32 %v452_v7, %v196_v6  ;;  %v472_v3 = vld [vmem:[#allocation5 + $0x560] sm:$0xff] }
  0x92   :  { %942 = vst [vmem:[#allocation7 + $0x410] sm:$0xff] %v686_v12  ;;  %v198_v12 = vld [vmem:[#allocation2 + $0x4d0] sm:$0xff]  ;;  %v709_v17 = vadd.f32 %v453_v10, %v197_v9  ;;  %v473_v6 = vld [vmem:[#allocation5 + $0x568] sm:$0xff] }
  0x93   :  { %943 = vst [vmem:[#allocation7 + $0x418] sm:$0xff] %v687_v15  ;;  %v199_v15 = vld [vmem:[#allocation2 + $0x4d8] sm:$0xff]  ;;  %v710_v20 = vadd.f32 %v454_v13, %v198_v12  ;;  %v474_v9 = vld [vmem:[#allocation5 + $0x570] sm:$0xff] }
  0x94   :  { %944 = vst [vmem:[#allocation7 + $0x420] sm:$0xff] %v688_v18  ;;  %v200_v18 = vld [vmem:[#allocation2 + $0x4e0] sm:$0xff]  ;;  %v711_v23 = vadd.f32 %v455_v16, %v199_v15  ;;  %v475_v12 = vld [vmem:[#allocation5 + $0x578] sm:$0xff] }
  0x95   :  { %945 = vst [vmem:[#allocation7 + $0x428] sm:$0xff] %v689_v21  ;;  %v201_v21 = vld [vmem:[#allocation2 + $0x4e8] sm:$0xff]  ;;  %v712_v26 = vadd.f32 %v456_v19, %v200_v18  ;;  %v476_v15 = vld [vmem:[#allocation5 + $0x580] sm:$0xff] }
  0x96   :  { %946 = vst [vmem:[#allocation7 + $0x430] sm:$0xff] %v690_v24  ;;  %v202_v24 = vld [vmem:[#allocation2 + $0x4f0] sm:$0xff]  ;;  %v713_v29 = vadd.f32 %v457_v22, %v201_v21  ;;  %v477_v18 = vld [vmem:[#allocation5 + $0x588] sm:$0xff] }
  0x97   :  { %947 = vst [vmem:[#allocation7 + $0x438] sm:$0xff] %v691_v27  ;;  %v203_v27 = vld [vmem:[#allocation2 + $0x4f8] sm:$0xff]  ;;  %v714_v32 = vadd.f32 %v458_v25, %v202_v24  ;;  %v478_v21 = vld [vmem:[#allocation5 + $0x590] sm:$0xff] }
  0x98   :  { %948 = vst [vmem:[#allocation7 + $0x440] sm:$0xff] %v692_v30  ;;  %v204_v30 = vld [vmem:[#allocation2 + $0x500] sm:$0xff]  ;;  %v715_v35 = vadd.f32 %v459_v28, %v203_v27  ;;  %v479_v24 = vld [vmem:[#allocation5 + $0x598] sm:$0xff] }
  0x99   :  { %949 = vst [vmem:[#allocation7 + $0x448] sm:$0xff] %v693_v33  ;;  %v205_v33 = vld [vmem:[#allocation2 + $0x508] sm:$0xff]  ;;  %v716_v38 = vadd.f32 %v460_v31, %v204_v30  ;;  %v480_v27 = vld [vmem:[#allocation5 + $0x5a0] sm:$0xff] }
  0x9a   :  { %950 = vst [vmem:[#allocation7 + $0x450] sm:$0xff] %v694_v36  ;;  %v206_v36 = vld [vmem:[#allocation2 + $0x510] sm:$0xff]  ;;  %v717_v41 = vadd.f32 %v461_v34, %v205_v33  ;;  %v481_v30 = vld [vmem:[#allocation5 + $0x5a8] sm:$0xff] }
  0x9b   :  { %951 = vst [vmem:[#allocation7 + $0x458] sm:$0xff] %v695_v39  ;;  %v207_v39 = vld [vmem:[#allocation2 + $0x518] sm:$0xff]  ;;  %v718_v44 = vadd.f32 %v462_v37, %v206_v36  ;;  %v482_v33 = vld [vmem:[#allocation5 + $0x5b0] sm:$0xff] }
  0x9c   :  { %952 = vst [vmem:[#allocation7 + $0x460] sm:$0xff] %v696_v42  ;;  %v208_v42 = vld [vmem:[#allocation2 + $0x520] sm:$0xff]  ;;  %v719_v47 = vadd.f32 %v463_v40, %v207_v39  ;;  %v483_v36 = vld [vmem:[#allocation5 + $0x5b8] sm:$0xff] }
  0x9d   :  { %953 = vst [vmem:[#allocation7 + $0x468] sm:$0xff] %v697_v45  ;;  %v209_v45 = vld [vmem:[#allocation2 + $0x528] sm:$0xff]  ;;  %v720_v50 = vadd.f32 %v464_v43, %v208_v42  ;;  %v484_v39 = vld [vmem:[#allocation5 + $0x5c0] sm:$0xff] }
  0x9e   :  { %954 = vst [vmem:[#allocation7 + $0x470] sm:$0xff] %v698_v48  ;;  %v210_v48 = vld [vmem:[#allocation2 + $0x530] sm:$0xff]  ;;  %v721_v53 = vadd.f32 %v465_v46, %v209_v45  ;;  %v485_v42 = vld [vmem:[#allocation5 + $0x5c8] sm:$0xff] }
  0x9f   :  { %955 = vst [vmem:[#allocation7 + $0x478] sm:$0xff] %v699_v51  ;;  %v211_v51 = vld [vmem:[#allocation2 + $0x538] sm:$0xff]  ;;  %v722_v56 = vadd.f32 %v466_v49, %v210_v48  ;;  %v486_v45 = vld [vmem:[#allocation5 + $0x5d0] sm:$0xff] }
  0xa0   :  { %956 = vst [vmem:[#allocation7 + $0x480] sm:$0xff] %v700_v54  ;;  %v212_v54 = vld [vmem:[#allocation2 + $0x540] sm:$0xff]  ;;  %v723_v59 = vadd.f32 %v467_v52, %v211_v51  ;;  %v487_v48 = vld [vmem:[#allocation5 + $0x5d8] sm:$0xff] }
  0xa1   :  { %957 = vst [vmem:[#allocation7 + $0x488] sm:$0xff] %v701_v57  ;;  %v213_v57 = vld [vmem:[#allocation2 + $0x548] sm:$0xff]  ;;  %v724_v62 = vadd.f32 %v468_v55, %v212_v54  ;;  %v488_v51 = vld [vmem:[#allocation5 + $0x5e0] sm:$0xff] }
  0xa2   :  { %958 = vst [vmem:[#allocation7 + $0x490] sm:$0xff] %v702_v60  ;;  %v214_v60 = vld [vmem:[#allocation2 + $0x550] sm:$0xff]  ;;  %v725_v1 = vadd.f32 %v469_v58, %v213_v57  ;;  %v489_v54 = vld [vmem:[#allocation5 + $0x5e8] sm:$0xff] }
  0xa3   :  { %959 = vst [vmem:[#allocation7 + $0x498] sm:$0xff] %v703_v63  ;;  %v215_v63 = vld [vmem:[#allocation2 + $0x558] sm:$0xff]  ;;  %v726_v4 = vadd.f32 %v470_v61, %v214_v60  ;;  %v490_v57 = vld [vmem:[#allocation5 + $0x5f0] sm:$0xff] }
  0xa4   :  { %960 = vst [vmem:[#allocation7 + $0x4a0] sm:$0xff] %v704_v2  ;;  %v216_v2 = vld [vmem:[#allocation2 + $0x560] sm:$0xff]  ;;  %v727_v7 = vadd.f32 %v471_v0, %v215_v63  ;;  %v491_v60 = vld [vmem:[#allocation5 + $0x5f8] sm:$0xff] }
  0xa5   :  { %961 = vst [vmem:[#allocation7 + $0x4a8] sm:$0xff] %v705_v5  ;;  %v217_v5 = vld [vmem:[#allocation2 + $0x568] sm:$0xff]  ;;  %v728_v10 = vadd.f32 %v472_v3, %v216_v2  ;;  %v492_v63 = vld [vmem:[#allocation5 + $0x600] sm:$0xff] }
  0xa6   :  { %962 = vst [vmem:[#allocation7 + $0x4b0] sm:$0xff] %v706_v8  ;;  %v218_v8 = vld [vmem:[#allocation2 + $0x570] sm:$0xff]  ;;  %v729_v13 = vadd.f32 %v473_v6, %v217_v5  ;;  %v493_v2 = vld [vmem:[#allocation5 + $0x608] sm:$0xff] }
  0xa7   :  { %963 = vst [vmem:[#allocation7 + $0x4b8] sm:$0xff] %v707_v11  ;;  %v219_v11 = vld [vmem:[#allocation2 + $0x578] sm:$0xff]  ;;  %v730_v16 = vadd.f32 %v474_v9, %v218_v8  ;;  %v494_v5 = vld [vmem:[#allocation5 + $0x610] sm:$0xff] }
  0xa8   :  { %964 = vst [vmem:[#allocation7 + $0x4c0] sm:$0xff] %v708_v14  ;;  %v220_v14 = vld [vmem:[#allocation2 + $0x580] sm:$0xff]  ;;  %v731_v19 = vadd.f32 %v475_v12, %v219_v11  ;;  %v495_v8 = vld [vmem:[#allocation5 + $0x618] sm:$0xff] }
  0xa9   :  { %965 = vst [vmem:[#allocation7 + $0x4c8] sm:$0xff] %v709_v17  ;;  %v221_v17 = vld [vmem:[#allocation2 + $0x588] sm:$0xff]  ;;  %v732_v22 = vadd.f32 %v476_v15, %v220_v14  ;;  %v496_v11 = vld [vmem:[#allocation5 + $0x620] sm:$0xff] }
  0xaa   :  { %966 = vst [vmem:[#allocation7 + $0x4d0] sm:$0xff] %v710_v20  ;;  %v222_v20 = vld [vmem:[#allocation2 + $0x590] sm:$0xff]  ;;  %v733_v25 = vadd.f32 %v477_v18, %v221_v17  ;;  %v497_v14 = vld [vmem:[#allocation5 + $0x628] sm:$0xff] }
  0xab   :  { %967 = vst [vmem:[#allocation7 + $0x4d8] sm:$0xff] %v711_v23  ;;  %v223_v23 = vld [vmem:[#allocation2 + $0x598] sm:$0xff]  ;;  %v734_v28 = vadd.f32 %v478_v21, %v222_v20  ;;  %v498_v17 = vld [vmem:[#allocation5 + $0x630] sm:$0xff] }
  0xac   :  { %968 = vst [vmem:[#allocation7 + $0x4e0] sm:$0xff] %v712_v26  ;;  %v224_v26 = vld [vmem:[#allocation2 + $0x5a0] sm:$0xff]  ;;  %v735_v31 = vadd.f32 %v479_v24, %v223_v23  ;;  %v499_v20 = vld [vmem:[#allocation5 + $0x638] sm:$0xff] }
  0xad   :  { %969 = vst [vmem:[#allocation7 + $0x4e8] sm:$0xff] %v713_v29  ;;  %v225_v29 = vld [vmem:[#allocation2 + $0x5a8] sm:$0xff]  ;;  %v736_v34 = vadd.f32 %v480_v27, %v224_v26  ;;  %v500_v23 = vld [vmem:[#allocation5 + $0x640] sm:$0xff] }
  0xae   :  { %970 = vst [vmem:[#allocation7 + $0x4f0] sm:$0xff] %v714_v32  ;;  %v226_v32 = vld [vmem:[#allocation2 + $0x5b0] sm:$0xff]  ;;  %v737_v37 = vadd.f32 %v481_v30, %v225_v29  ;;  %v501_v26 = vld [vmem:[#allocation5 + $0x648] sm:$0xff] }
  0xaf   :  { %971 = vst [vmem:[#allocation7 + $0x4f8] sm:$0xff] %v715_v35  ;;  %v227_v35 = vld [vmem:[#allocation2 + $0x5b8] sm:$0xff]  ;;  %v738_v40 = vadd.f32 %v482_v33, %v226_v32  ;;  %v502_v29 = vld [vmem:[#allocation5 + $0x650] sm:$0xff] }
  0xb0   :  { %972 = vst [vmem:[#allocation7 + $0x500] sm:$0xff] %v716_v38  ;;  %v228_v38 = vld [vmem:[#allocation2 + $0x5c0] sm:$0xff]  ;;  %v739_v43 = vadd.f32 %v483_v36, %v227_v35  ;;  %v503_v32 = vld [vmem:[#allocation5 + $0x658] sm:$0xff] }
  0xb1   :  { %973 = vst [vmem:[#allocation7 + $0x508] sm:$0xff] %v717_v41  ;;  %v229_v41 = vld [vmem:[#allocation2 + $0x5c8] sm:$0xff]  ;;  %v740_v46 = vadd.f32 %v484_v39, %v228_v38  ;;  %v504_v35 = vld [vmem:[#allocation5 + $0x660] sm:$0xff] }
  0xb2   :  { %974 = vst [vmem:[#allocation7 + $0x510] sm:$0xff] %v718_v44  ;;  %v230_v44 = vld [vmem:[#allocation2 + $0x5d0] sm:$0xff]  ;;  %v741_v49 = vadd.f32 %v485_v42, %v229_v41  ;;  %v505_v38 = vld [vmem:[#allocation5 + $0x668] sm:$0xff] }
  0xb3   :  { %975 = vst [vmem:[#allocation7 + $0x518] sm:$0xff] %v719_v47  ;;  %v231_v47 = vld [vmem:[#allocation2 + $0x5d8] sm:$0xff]  ;;  %v742_v52 = vadd.f32 %v486_v45, %v230_v44  ;;  %v506_v41 = vld [vmem:[#allocation5 + $0x670] sm:$0xff] }
  0xb4   :  { %976 = vst [vmem:[#allocation7 + $0x520] sm:$0xff] %v720_v50  ;;  %v232_v50 = vld [vmem:[#allocation2 + $0x5e0] sm:$0xff]  ;;  %v743_v55 = vadd.f32 %v487_v48, %v231_v47  ;;  %v507_v44 = vld [vmem:[#allocation5 + $0x678] sm:$0xff] }
  0xb5   :  { %977 = vst [vmem:[#allocation7 + $0x528] sm:$0xff] %v721_v53  ;;  %v233_v53 = vld [vmem:[#allocation2 + $0x5e8] sm:$0xff]  ;;  %v744_v58 = vadd.f32 %v488_v51, %v232_v50  ;;  %v508_v47 = vld [vmem:[#allocation5 + $0x680] sm:$0xff] }
  0xb6   :  { %978 = vst [vmem:[#allocation7 + $0x530] sm:$0xff] %v722_v56  ;;  %v234_v56 = vld [vmem:[#allocation2 + $0x5f0] sm:$0xff]  ;;  %v745_v61 = vadd.f32 %v489_v54, %v233_v53  ;;  %v509_v50 = vld [vmem:[#allocation5 + $0x688] sm:$0xff] }
  0xb7   :  { %979 = vst [vmem:[#allocation7 + $0x538] sm:$0xff] %v723_v59  ;;  %v235_v59 = vld [vmem:[#allocation2 + $0x5f8] sm:$0xff]  ;;  %v746_v0 = vadd.f32 %v490_v57, %v234_v56  ;;  %v510_v53 = vld [vmem:[#allocation5 + $0x690] sm:$0xff] }
  0xb8   :  { %980 = vst [vmem:[#allocation7 + $0x540] sm:$0xff] %v724_v62  ;;  %v236_v62 = vld [vmem:[#allocation2 + $0x600] sm:$0xff]  ;;  %v747_v3 = vadd.f32 %v491_v60, %v235_v59  ;;  %v511_v56 = vld [vmem:[#allocation5 + $0x698] sm:$0xff] }
  0xb9   :  { %981 = vst [vmem:[#allocation7 + $0x548] sm:$0xff] %v725_v1  ;;  %v237_v1 = vld [vmem:[#allocation2 + $0x608] sm:$0xff]  ;;  %v748_v6 = vadd.f32 %v492_v63, %v236_v62  ;;  %v512_v59 = vld [vmem:[#allocation5 + $0x6a0] sm:$0xff] }
  0xba   :  { %982 = vst [vmem:[#allocation7 + $0x550] sm:$0xff] %v726_v4  ;;  %v238_v4 = vld [vmem:[#allocation2 + $0x610] sm:$0xff]  ;;  %v749_v9 = vadd.f32 %v493_v2, %v237_v1  ;;  %v513_v62 = vld [vmem:[#allocation5 + $0x6a8] sm:$0xff] }
  0xbb   :  { %983 = vst [vmem:[#allocation7 + $0x558] sm:$0xff] %v727_v7  ;;  %v239_v7 = vld [vmem:[#allocation2 + $0x618] sm:$0xff]  ;;  %v750_v12 = vadd.f32 %v494_v5, %v238_v4  ;;  %v514_v1 = vld [vmem:[#allocation5 + $0x6b0] sm:$0xff] }
  0xbc   :  { %984 = vst [vmem:[#allocation7 + $0x560] sm:$0xff] %v728_v10  ;;  %v240_v10 = vld [vmem:[#allocation2 + $0x620] sm:$0xff]  ;;  %v751_v15 = vadd.f32 %v495_v8, %v239_v7  ;;  %v515_v4 = vld [vmem:[#allocation5 + $0x6b8] sm:$0xff] }
  0xbd   :  { %985 = vst [vmem:[#allocation7 + $0x568] sm:$0xff] %v729_v13  ;;  %v241_v13 = vld [vmem:[#allocation2 + $0x628] sm:$0xff]  ;;  %v752_v18 = vadd.f32 %v496_v11, %v240_v10  ;;  %v516_v7 = vld [vmem:[#allocation5 + $0x6c0] sm:$0xff] }
  0xbe   :  { %986 = vst [vmem:[#allocation7 + $0x570] sm:$0xff] %v730_v16  ;;  %v242_v16 = vld [vmem:[#allocation2 + $0x630] sm:$0xff]  ;;  %v753_v21 = vadd.f32 %v497_v14, %v241_v13  ;;  %v517_v10 = vld [vmem:[#allocation5 + $0x6c8] sm:$0xff] }
  0xbf   :  { %987 = vst [vmem:[#allocation7 + $0x578] sm:$0xff] %v731_v19  ;;  %v243_v19 = vld [vmem:[#allocation2 + $0x638] sm:$0xff]  ;;  %v754_v24 = vadd.f32 %v498_v17, %v242_v16  ;;  %v518_v13 = vld [vmem:[#allocation5 + $0x6d0] sm:$0xff] }
  0xc0   :  { %988 = vst [vmem:[#allocation7 + $0x580] sm:$0xff] %v732_v22  ;;  %v244_v22 = vld [vmem:[#allocation2 + $0x640] sm:$0xff]  ;;  %v755_v27 = vadd.f32 %v499_v20, %v243_v19  ;;  %v519_v16 = vld [vmem:[#allocation5 + $0x6d8] sm:$0xff] }
  0xc1   :  { %989 = vst [vmem:[#allocation7 + $0x588] sm:$0xff] %v733_v25  ;;  %v245_v25 = vld [vmem:[#allocation2 + $0x648] sm:$0xff]  ;;  %v756_v30 = vadd.f32 %v500_v23, %v244_v22  ;;  %v520_v19 = vld [vmem:[#allocation5 + $0x6e0] sm:$0xff] }
  0xc2   :  { %990 = vst [vmem:[#allocation7 + $0x590] sm:$0xff] %v734_v28  ;;  %v246_v28 = vld [vmem:[#allocation2 + $0x650] sm:$0xff]  ;;  %v757_v33 = vadd.f32 %v501_v26, %v245_v25  ;;  %v521_v22 = vld [vmem:[#allocation5 + $0x6e8] sm:$0xff] }
  0xc3   :  { %991 = vst [vmem:[#allocation7 + $0x598] sm:$0xff] %v735_v31  ;;  %v247_v31 = vld [vmem:[#allocation2 + $0x658] sm:$0xff]  ;;  %v758_v36 = vadd.f32 %v502_v29, %v246_v28  ;;  %v522_v25 = vld [vmem:[#allocation5 + $0x6f0] sm:$0xff] }
  0xc4   :  { %992 = vst [vmem:[#allocation7 + $0x5a0] sm:$0xff] %v736_v34  ;;  %v248_v34 = vld [vmem:[#allocation2 + $0x660] sm:$0xff]  ;;  %v759_v39 = vadd.f32 %v503_v32, %v247_v31  ;;  %v523_v28 = vld [vmem:[#allocation5 + $0x6f8] sm:$0xff] }
  0xc5   :  { %993 = vst [vmem:[#allocation7 + $0x5a8] sm:$0xff] %v737_v37  ;;  %v249_v37 = vld [vmem:[#allocation2 + $0x668] sm:$0xff]  ;;  %v760_v42 = vadd.f32 %v504_v35, %v248_v34  ;;  %v524_v31 = vld [vmem:[#allocation5 + $0x700] sm:$0xff] }
  0xc6   :  { %994 = vst [vmem:[#allocation7 + $0x5b0] sm:$0xff] %v738_v40  ;;  %v250_v40 = vld [vmem:[#allocation2 + $0x670] sm:$0xff]  ;;  %v761_v45 = vadd.f32 %v505_v38, %v249_v37  ;;  %v525_v34 = vld [vmem:[#allocation5 + $0x708] sm:$0xff] }
  0xc7   :  { %995 = vst [vmem:[#allocation7 + $0x5b8] sm:$0xff] %v739_v43  ;;  %v251_v43 = vld [vmem:[#allocation2 + $0x678] sm:$0xff]  ;;  %v762_v48 = vadd.f32 %v506_v41, %v250_v40  ;;  %v526_v37 = vld [vmem:[#allocation5 + $0x710] sm:$0xff] }
  0xc8   :  { %996 = vst [vmem:[#allocation7 + $0x5c0] sm:$0xff] %v740_v46  ;;  %v252_v46 = vld [vmem:[#allocation2 + $0x680] sm:$0xff]  ;;  %v763_v51 = vadd.f32 %v507_v44, %v251_v43  ;;  %v527_v40 = vld [vmem:[#allocation5 + $0x718] sm:$0xff] }
  0xc9   :  { %997 = vst [vmem:[#allocation7 + $0x5c8] sm:$0xff] %v741_v49  ;;  %v253_v49 = vld [vmem:[#allocation2 + $0x688] sm:$0xff]  ;;  %v764_v54 = vadd.f32 %v508_v47, %v252_v46  ;;  %v528_v43 = vld [vmem:[#allocation5 + $0x720] sm:$0xff] }
  0xca   :  { %998 = vst [vmem:[#allocation7 + $0x5d0] sm:$0xff] %v742_v52  ;;  %v254_v52 = vld [vmem:[#allocation2 + $0x690] sm:$0xff]  ;;  %v765_v57 = vadd.f32 %v509_v50, %v253_v49  ;;  %v529_v46 = vld [vmem:[#allocation5 + $0x728] sm:$0xff] }
  0xcb   :  { %999 = vst [vmem:[#allocation7 + $0x5d8] sm:$0xff] %v743_v55  ;;  %v255_v55 = vld [vmem:[#allocation2 + $0x698] sm:$0xff]  ;;  %v766_v60 = vadd.f32 %v510_v53, %v254_v52  ;;  %v530_v49 = vld [vmem:[#allocation5 + $0x730] sm:$0xff] }
  0xcc   :  { %1000 = vst [vmem:[#allocation7 + $0x5e0] sm:$0xff] %v744_v58  ;;  %v256_v58 = vld [vmem:[#allocation2 + $0x6a0] sm:$0xff]  ;;  %v767_v63 = vadd.f32 %v511_v56, %v255_v55  ;;  %v531_v52 = vld [vmem:[#allocation5 + $0x738] sm:$0xff] }
  0xcd   :  { %1001 = vst [vmem:[#allocation7 + $0x5e8] sm:$0xff] %v745_v61  ;;  %v257_v61 = vld [vmem:[#allocation2 + $0x6a8] sm:$0xff]  ;;  %v768_v2 = vadd.f32 %v512_v59, %v256_v58  ;;  %v532_v55 = vld [vmem:[#allocation5 + $0x740] sm:$0xff] }
  0xce   :  { %1002 = vst [vmem:[#allocation7 + $0x5f0] sm:$0xff] %v746_v0  ;;  %v258_v0 = vld [vmem:[#allocation2 + $0x6b0] sm:$0xff]  ;;  %v769_v5 = vadd.f32 %v513_v62, %v257_v61  ;;  %v533_v58 = vld [vmem:[#allocation5 + $0x748] sm:$0xff] }
  0xcf   :  { %1003 = vst [vmem:[#allocation7 + $0x5f8] sm:$0xff] %v747_v3  ;;  %v259_v3 = vld [vmem:[#allocation2 + $0x6b8] sm:$0xff]  ;;  %v770_v8 = vadd.f32 %v514_v1, %v258_v0  ;;  %v534_v61 = vld [vmem:[#allocation5 + $0x750] sm:$0xff] }
  0xd0   :  { %1004 = vst [vmem:[#allocation7 + $0x600] sm:$0xff] %v748_v6  ;;  %v260_v6 = vld [vmem:[#allocation2 + $0x6c0] sm:$0xff]  ;;  %v771_v11 = vadd.f32 %v515_v4, %v259_v3  ;;  %v535_v0 = vld [vmem:[#allocation5 + $0x758] sm:$0xff] }
  0xd1   :  { %1005 = vst [vmem:[#allocation7 + $0x608] sm:$0xff] %v749_v9  ;;  %v261_v9 = vld [vmem:[#allocation2 + $0x6c8] sm:$0xff]  ;;  %v772_v14 = vadd.f32 %v516_v7, %v260_v6  ;;  %v536_v3 = vld [vmem:[#allocation5 + $0x760] sm:$0xff] }
  0xd2   :  { %1006 = vst [vmem:[#allocation7 + $0x610] sm:$0xff] %v750_v12  ;;  %v262_v12 = vld [vmem:[#allocation2 + $0x6d0] sm:$0xff]  ;;  %v773_v17 = vadd.f32 %v517_v10, %v261_v9  ;;  %v537_v6 = vld [vmem:[#allocation5 + $0x768] sm:$0xff] }
  0xd3   :  { %1007 = vst [vmem:[#allocation7 + $0x618] sm:$0xff] %v751_v15  ;;  %v263_v15 = vld [vmem:[#allocation2 + $0x6d8] sm:$0xff]  ;;  %v774_v20 = vadd.f32 %v518_v13, %v262_v12  ;;  %v538_v9 = vld [vmem:[#allocation5 + $0x770] sm:$0xff] }
  0xd4   :  { %1008 = vst [vmem:[#allocation7 + $0x620] sm:$0xff] %v752_v18  ;;  %v264_v18 = vld [vmem:[#allocation2 + $0x6e0] sm:$0xff]  ;;  %v775_v23 = vadd.f32 %v519_v16, %v263_v15  ;;  %v539_v12 = vld [vmem:[#allocation5 + $0x778] sm:$0xff] }
  0xd5   :  { %1009 = vst [vmem:[#allocation7 + $0x628] sm:$0xff] %v753_v21  ;;  %v265_v21 = vld [vmem:[#allocation2 + $0x6e8] sm:$0xff]  ;;  %v776_v26 = vadd.f32 %v520_v19, %v264_v18  ;;  %v540_v15 = vld [vmem:[#allocation5 + $0x780] sm:$0xff] }
  0xd6   :  { %1010 = vst [vmem:[#allocation7 + $0x630] sm:$0xff] %v754_v24  ;;  %v266_v24 = vld [vmem:[#allocation2 + $0x6f0] sm:$0xff]  ;;  %v777_v29 = vadd.f32 %v521_v22, %v265_v21  ;;  %v541_v18 = vld [vmem:[#allocation5 + $0x788] sm:$0xff] }
  0xd7   :  { %1011 = vst [vmem:[#allocation7 + $0x638] sm:$0xff] %v755_v27  ;;  %v267_v27 = vld [vmem:[#allocation2 + $0x6f8] sm:$0xff]  ;;  %v778_v32 = vadd.f32 %v522_v25, %v266_v24  ;;  %v542_v21 = vld [vmem:[#allocation5 + $0x790] sm:$0xff] }
  0xd8   :  { %1012 = vst [vmem:[#allocation7 + $0x640] sm:$0xff] %v756_v30  ;;  %v268_v30 = vld [vmem:[#allocation2 + $0x700] sm:$0xff]  ;;  %v779_v35 = vadd.f32 %v523_v28, %v267_v27  ;;  %v543_v24 = vld [vmem:[#allocation5 + $0x798] sm:$0xff] }
  0xd9   :  { %1013 = vst [vmem:[#allocation7 + $0x648] sm:$0xff] %v757_v33  ;;  %v269_v33 = vld [vmem:[#allocation2 + $0x708] sm:$0xff]  ;;  %v780_v38 = vadd.f32 %v524_v31, %v268_v30  ;;  %v544_v27 = vld [vmem:[#allocation5 + $0x7a0] sm:$0xff] }
  0xda   :  { %1014 = vst [vmem:[#allocation7 + $0x650] sm:$0xff] %v758_v36  ;;  %v270_v36 = vld [vmem:[#allocation2 + $0x710] sm:$0xff]  ;;  %v781_v41 = vadd.f32 %v525_v34, %v269_v33  ;;  %v545_v30 = vld [vmem:[#allocation5 + $0x7a8] sm:$0xff] }
  0xdb   :  { %1015 = vst [vmem:[#allocation7 + $0x658] sm:$0xff] %v759_v39  ;;  %v271_v39 = vld [vmem:[#allocation2 + $0x718] sm:$0xff]  ;;  %v782_v44 = vadd.f32 %v526_v37, %v270_v36  ;;  %v546_v33 = vld [vmem:[#allocation5 + $0x7b0] sm:$0xff] }
  0xdc   :  { %1016 = vst [vmem:[#allocation7 + $0x660] sm:$0xff] %v760_v42  ;;  %v272_v42 = vld [vmem:[#allocation2 + $0x720] sm:$0xff]  ;;  %v783_v47 = vadd.f32 %v527_v40, %v271_v39  ;;  %v547_v36 = vld [vmem:[#allocation5 + $0x7b8] sm:$0xff] }
  0xdd   :  { %1017 = vst [vmem:[#allocation7 + $0x668] sm:$0xff] %v761_v45  ;;  %v273_v45 = vld [vmem:[#allocation2 + $0x728] sm:$0xff]  ;;  %v784_v50 = vadd.f32 %v528_v43, %v272_v42  ;;  %v548_v39 = vld [vmem:[#allocation5 + $0x7c0] sm:$0xff] }
  0xde   :  { %1018 = vst [vmem:[#allocation7 + $0x670] sm:$0xff] %v762_v48  ;;  %v274_v48 = vld [vmem:[#allocation2 + $0x730] sm:$0xff]  ;;  %v785_v53 = vadd.f32 %v529_v46, %v273_v45  ;;  %v549_v42 = vld [vmem:[#allocation5 + $0x7c8] sm:$0xff] }
  0xdf   :  { %1019 = vst [vmem:[#allocation7 + $0x678] sm:$0xff] %v763_v51  ;;  %v275_v51 = vld [vmem:[#allocation2 + $0x738] sm:$0xff]  ;;  %v786_v56 = vadd.f32 %v530_v49, %v274_v48  ;;  %v550_v45 = vld [vmem:[#allocation5 + $0x7d0] sm:$0xff] }
  0xe0   :  { %1020 = vst [vmem:[#allocation7 + $0x680] sm:$0xff] %v764_v54  ;;  %v276_v54 = vld [vmem:[#allocation2 + $0x740] sm:$0xff]  ;;  %v787_v59 = vadd.f32 %v531_v52, %v275_v51  ;;  %v551_v48 = vld [vmem:[#allocation5 + $0x7d8] sm:$0xff] }
  0xe1   :  { %1021 = vst [vmem:[#allocation7 + $0x688] sm:$0xff] %v765_v57  ;;  %v277_v57 = vld [vmem:[#allocation2 + $0x748] sm:$0xff]  ;;  %v788_v62 = vadd.f32 %v532_v55, %v276_v54  ;;  %v552_v51 = vld [vmem:[#allocation5 + $0x7e0] sm:$0xff] }
  0xe2   :  { %1022 = vst [vmem:[#allocation7 + $0x690] sm:$0xff] %v766_v60  ;;  %v278_v60 = vld [vmem:[#allocation2 + $0x750] sm:$0xff]  ;;  %v789_v1 = vadd.f32 %v533_v58, %v277_v57  ;;  %v553_v54 = vld [vmem:[#allocation5 + $0x7e8] sm:$0xff] }
  0xe3   :  { %1023 = vst [vmem:[#allocation7 + $0x698] sm:$0xff] %v767_v63  ;;  %v279_v63 = vld [vmem:[#allocation2 + $0x758] sm:$0xff]  ;;  %v790_v4 = vadd.f32 %v534_v61, %v278_v60  ;;  %v554_v57 = vld [vmem:[#allocation5 + $0x7f0] sm:$0xff] }
  0xe4   :  { %1024 = vst [vmem:[#allocation7 + $0x6a0] sm:$0xff] %v768_v2  ;;  %v280_v2 = vld [vmem:[#allocation2 + $0x760] sm:$0xff]  ;;  %v791_v7 = vadd.f32 %v535_v0, %v279_v63  ;;  %v555_v60 = vld [vmem:[#allocation5 + $0x7f8] sm:$0xff] }
  0xe5   :  { %1025 = vst [vmem:[#allocation7 + $0x6a8] sm:$0xff] %v769_v5  ;;  %v281_v5 = vld [vmem:[#allocation2 + $0x768] sm:$0xff]  ;;  %v792_v10 = vadd.f32 %v536_v3, %v280_v2 }
  0xe6   :  { %1026 = vst [vmem:[#allocation7 + $0x6b0] sm:$0xff] %v770_v8  ;;  %v282_v8 = vld [vmem:[#allocation2 + $0x770] sm:$0xff]  ;;  %v793_v13 = vadd.f32 %v537_v6, %v281_v5 }
  0xe7   :  { %1027 = vst [vmem:[#allocation7 + $0x6b8] sm:$0xff] %v771_v11  ;;  %v283_v11 = vld [vmem:[#allocation2 + $0x778] sm:$0xff]  ;;  %v794_v16 = vadd.f32 %v538_v9, %v282_v8 }
  0xe8   :  { %1028 = vst [vmem:[#allocation7 + $0x6c0] sm:$0xff] %v772_v14  ;;  %v284_v14 = vld [vmem:[#allocation2 + $0x780] sm:$0xff]  ;;  %v795_v19 = vadd.f32 %v539_v12, %v283_v11 }
  0xe9   :  { %1029 = vst [vmem:[#allocation7 + $0x6c8] sm:$0xff] %v773_v17  ;;  %v285_v17 = vld [vmem:[#allocation2 + $0x788] sm:$0xff]  ;;  %v796_v22 = vadd.f32 %v540_v15, %v284_v14 }
  0xea   :  { %1030 = vst [vmem:[#allocation7 + $0x6d0] sm:$0xff] %v774_v20  ;;  %v286_v20 = vld [vmem:[#allocation2 + $0x790] sm:$0xff]  ;;  %v797_v25 = vadd.f32 %v541_v18, %v285_v17 }
  0xeb   :  { %1031 = vst [vmem:[#allocation7 + $0x6d8] sm:$0xff] %v775_v23  ;;  %v287_v23 = vld [vmem:[#allocation2 + $0x798] sm:$0xff]  ;;  %v798_v28 = vadd.f32 %v542_v21, %v286_v20 }
  0xec   :  { %1032 = vst [vmem:[#allocation7 + $0x6e0] sm:$0xff] %v776_v26  ;;  %v288_v26 = vld [vmem:[#allocation2 + $0x7a0] sm:$0xff]  ;;  %v799_v31 = vadd.f32 %v543_v24, %v287_v23 }
  0xed   :  { %1033 = vst [vmem:[#allocation7 + $0x6e8] sm:$0xff] %v777_v29  ;;  %v289_v29 = vld [vmem:[#allocation2 + $0x7a8] sm:$0xff]  ;;  %v800_v34 = vadd.f32 %v544_v27, %v288_v26 }
  0xee   :  { %1034 = vst [vmem:[#allocation7 + $0x6f0] sm:$0xff] %v778_v32  ;;  %v290_v32 = vld [vmem:[#allocation2 + $0x7b0] sm:$0xff]  ;;  %v801_v37 = vadd.f32 %v545_v30, %v289_v29 }
  0xef   :  { %1035 = vst [vmem:[#allocation7 + $0x6f8] sm:$0xff] %v779_v35  ;;  %v291_v35 = vld [vmem:[#allocation2 + $0x7b8] sm:$0xff]  ;;  %v802_v40 = vadd.f32 %v546_v33, %v290_v32 }
  0xf0   :  { %1036 = vst [vmem:[#allocation7 + $0x700] sm:$0xff] %v780_v38  ;;  %v292_v38 = vld [vmem:[#allocation2 + $0x7c0] sm:$0xff]  ;;  %v803_v43 = vadd.f32 %v547_v36, %v291_v35 }
  0xf1   :  { %1037 = vst [vmem:[#allocation7 + $0x708] sm:$0xff] %v781_v41  ;;  %v293_v41 = vld [vmem:[#allocation2 + $0x7c8] sm:$0xff]  ;;  %v804_v46 = vadd.f32 %v548_v39, %v292_v38 }
  0xf2   :  { %1038 = vst [vmem:[#allocation7 + $0x710] sm:$0xff] %v782_v44  ;;  %v294_v44 = vld [vmem:[#allocation2 + $0x7d0] sm:$0xff]  ;;  %v805_v49 = vadd.f32 %v549_v42, %v293_v41 }
  0xf3   :  { %1039 = vst [vmem:[#allocation7 + $0x718] sm:$0xff] %v783_v47  ;;  %v295_v47 = vld [vmem:[#allocation2 + $0x7d8] sm:$0xff]  ;;  %v806_v52 = vadd.f32 %v550_v45, %v294_v44 }
  0xf4   :  { %1040 = vst [vmem:[#allocation7 + $0x720] sm:$0xff] %v784_v50  ;;  %v296_v50 = vld [vmem:[#allocation2 + $0x7e0] sm:$0xff]  ;;  %v807_v55 = vadd.f32 %v551_v48, %v295_v47 }
  0xf5   :  { %1041 = vst [vmem:[#allocation7 + $0x728] sm:$0xff] %v785_v53  ;;  %v297_v53 = vld [vmem:[#allocation2 + $0x7e8] sm:$0xff]  ;;  %v808_v58 = vadd.f32 %v552_v51, %v296_v50 }
  0xf6   :  { %1042 = vst [vmem:[#allocation7 + $0x730] sm:$0xff] %v786_v56  ;;  %v298_v56 = vld [vmem:[#allocation2 + $0x7f0] sm:$0xff]  ;;  %v809_v61 = vadd.f32 %v553_v54, %v297_v53 }
  0xf7   :  { %1043 = vst [vmem:[#allocation7 + $0x738] sm:$0xff] %v787_v59  ;;  %v299_v59 = vld [vmem:[#allocation2 + $0x7f8] sm:$0xff] }
  0xf8   :  { %1044 = vst [vmem:[#allocation7 + $0x740] sm:$0xff] %v788_v62  ;;  %v810_v62 = vadd.f32 %v554_v57, %v298_v56  ;;  %v811_v63 = vadd.f32 %v555_v60, %v299_v59 }
  0xf9   :  { %1045 = vst [vmem:[#allocation7 + $0x748] sm:$0xff] %v789_v1 }
  0xfa   :  { %1046 = vst [vmem:[#allocation7 + $0x750] sm:$0xff] %v790_v4 }
  0xfb   :  { %1047 = vst [vmem:[#allocation7 + $0x758] sm:$0xff] %v791_v7 }
  0xfc   :  { %1048 = vst [vmem:[#allocation7 + $0x760] sm:$0xff] %v792_v10 }
  0xfd   :  { %1049 = vst [vmem:[#allocation7 + $0x768] sm:$0xff] %v793_v13 }
  0xfe   :  { %1050 = vst [vmem:[#allocation7 + $0x770] sm:$0xff] %v794_v16 }
  0xff   :  { %1051 = vst [vmem:[#allocation7 + $0x778] sm:$0xff] %v795_v19 }
 0x100   :  { %1052 = vst [vmem:[#allocation7 + $0x780] sm:$0xff] %v796_v22 }
 0x101   :  { %1053 = vst [vmem:[#allocation7 + $0x788] sm:$0xff] %v797_v25 }
 0x102   :  { %1054 = vst [vmem:[#allocation7 + $0x790] sm:$0xff] %v798_v28 }
 0x103   :  { %1055 = vst [vmem:[#allocation7 + $0x798] sm:$0xff] %v799_v31 }
 0x104   :  { %1056 = vst [vmem:[#allocation7 + $0x7a0] sm:$0xff] %v800_v34 }
 0x105   :  { %1057 = vst [vmem:[#allocation7 + $0x7a8] sm:$0xff] %v801_v37 }
 0x106   :  { %1058 = vst [vmem:[#allocation7 + $0x7b0] sm:$0xff] %v802_v40 }
 0x107   :  { %1059 = vst [vmem:[#allocation7 + $0x7b8] sm:$0xff] %v803_v43 }
 0x108   :  { %1060 = vst [vmem:[#allocation7 + $0x7c0] sm:$0xff] %v804_v46 }
 0x109   :  { %1061 = vst [vmem:[#allocation7 + $0x7c8] sm:$0xff] %v805_v49 }
 0x10a   :  { %1062 = vst [vmem:[#allocation7 + $0x7d0] sm:$0xff] %v806_v52 }
 0x10b   :  { %1063 = vst [vmem:[#allocation7 + $0x7d8] sm:$0xff] %v807_v55 }
 0x10c   :  { %1064 = vst [vmem:[#allocation7 + $0x7e0] sm:$0xff] %v808_v58 }
 0x10d   :  { %1065 = vst [vmem:[#allocation7 + $0x7e8] sm:$0xff] %v809_v61 }
 0x10e   :  { %1066 = vst [vmem:[#allocation7 + $0x7f0] sm:$0xff] %v810_v62 }
 0x10f   :  { %1067 = vst [vmem:[#allocation7 + $0x7f8] sm:$0xff] %v811_v63 }
 0x110   :  { %1080 = dma.vmem_to_hbm [thread:$0]  %s1073_s1, 32768, %s1075_s23, [#allocation4], %s1172_s17, %s1172_s17, %s1173_s18  }
 0x111   :  { %1169 = dma.done.wait [#allocation4], 32768  }
 0x112   :  { %1170 = vsyncadd [#allocation4], 4294934528 }
 0x113   :  { %1085 = vsyncpa [#allocation3], 1 }
 0x114   :  { %1086 = vsyncpa [#allocation6], 1 }
 0x115   :  { %1087 = vsyncpa [#allocation4], 1 }

</bundles_post_ra>
